<compile_context>
chip_gen: v6e
topology: v6e:2x2x1
jax: 0.10.0
libtpu: 0.0.40
codegen_flags: <defaults>
</compile_context>

<pallas_src>
import math
from functools import partial

import jax
import jax.numpy as jnp
from jax.experimental import pallas as pl
from jax.experimental.pallas import tpu as pltpu

LEAKY_SLOPE = 0.2
INV_SQRT2 = 1.0 / math.sqrt(2.0)


def _round_up(x, m):
    return (x + m - 1) // m * m


def _default_vmem_limit():
    """Per-generation VMEM budget: 75% of physical, capped at 96 MiB.
    v5e/v6e (128 MiB) -> 96 MiB; v7x (64 MiB) -> 48 MiB; fallback 48 MiB."""
    cap = 64 * 1024 * 1024
    try:
        cap = int(pltpu.get_tpu_info().vmem_capacity_bytes)
    except Exception:
        pass
    return min(cap * 3 // 4, 96 * 1024 * 1024)


VMEM_LIMIT = _default_vmem_limit()


# ----------------------------- Pallas kernels -----------------------------

def _matmul_bias_kernel(a_ref, w_ref, b_ref, o_ref, acc_ref, *, leaky_in):
    """o = [leaky(a)] @ w + b, accumulated over the k (last) grid axis.

    a: bf16 (tm, tk), w: bf16 (tk, tn), b: f32 (1, tn); f32 accumulation.
    """
    k = pl.program_id(2)

    @pl.when(k == 0)
    def _():
        acc_ref[...] = jnp.zeros_like(acc_ref)

    a = a_ref[...]
    if leaky_in:  # LeakyReLU(0.2) fused on the conv input (bf16 VPU path)
        a = jnp.where(a >= 0, a, LEAKY_SLOPE * a)
    acc_ref[...] += jnp.dot(a, w_ref[...], preferred_element_type=jnp.float32)

    @pl.when(k == pl.num_programs(2) - 1)
    def _():
        o_ref[...] = (acc_ref[...] + b_ref[...]).astype(o_ref.dtype)


def _conv3x3_kernel(x_ref, w_ref, b_ref, *rest, taps, leaky_in, fuse_sc):
    """Direct 3x3 conv: 9 shifted-window matmuls over the padded, row-flattened
    activation (no materialised im2col).

    Grid = (Cout tiles,); the x block index is constant so the pipeline copies
    it from HBM only once.  LeakyReLU + bf16 cast are applied ONCE per step
    into a VMEM scratch (unconditional -> megacore-safe), the 9 tap dots are
    summed into a single value, and the ResBlk epilogue
    (conv + bias + shortcut)/sqrt(2) is optionally fused.
    """
    if fuse_sc:
        sc_ref, o_ref, xs_ref = rest
    else:
        o_ref, xs_ref = rest

    # Stage leaky(x) as bf16 once per grid step (cheap vs. the 9-tap MXU work,
    # and correct even if the Cout axis is split across TensorCores).
    xv = x_ref[...]
    if leaky_in:
        xv = jnp.where(xv >= 0, xv, LEAKY_SLOPE * xv)
    xs_ref[...] = xv.astype(jnp.bfloat16)

    mo = o_ref.shape[0]
    acc = None
    for t, off in enumerate(taps):            # static (dy, dx) row offsets
        d = jnp.dot(xs_ref[pl.ds(off, mo), :], w_ref[t],
                    preferred_element_type=jnp.float32)
        acc = d if acc is None else acc + d

    r = acc + b_ref[...]
    if fuse_sc:
        r = (r + sc_ref[...].astype(jnp.float32)) * INV_SQRT2
    o_ref[...] = r.astype(o_ref.dtype)


# ----------------------------- Pallas wrappers -----------------------------

def matmul_bias(a, w_p, b_p, n_valid, *, leaky_in=False, out_dtype=jnp.float32):
    """(M, K) @ (Kp, Np) bf16 + bias.  Weights/bias pre-padded at init; the
    padded LHS is cast to bf16 here (the pad already materialises a copy)."""
    M, K = a.shape
    Kp, Np = w_p.shape

    Mp0 = _round_up(M, 8)
    tm = Mp0 if Mp0 <= 512 else 256
    Mp = _round_up(M, tm)
    small_m = Mp0 <= 64                        # e.g. the 4x4 head conv (M = batch)

    tk = min(2048 if small_m else 1024, Kp)    # big K tiles -> few steps, big DMAs
    while Kp % tk:
        tk //= 2
    tn = 512 if Np >= 1024 else min(256, Np)   # >=2 output blocks for dual-TC chips
    while Np % tn:
        tn //= 2

    a_p = jnp.pad(a, ((0, Mp - M), (0, Kp - K))).astype(jnp.bfloat16)

    grid = (Mp // tm, Np // tn, Kp // tk)
    out = pl.pallas_call(
        partial(_matmul_bias_kernel, leaky_in=leaky_in),
        out_shape=jax.ShapeDtypeStruct((Mp, Np), out_dtype),
        grid_spec=pltpu.PrefetchScalarGridSpec(
            num_scalar_prefetch=0,
            grid=grid,
            in_specs=[
                pl.BlockSpec((tm, tk), lambda i, j, k: (i, k)),
                pl.BlockSpec((tk, tn), lambda i, j, k: (k, j)),
                pl.BlockSpec((1, tn), lambda i, j, k: (0, j)),
            ],
            out_specs=pl.BlockSpec((tm, tn), lambda i, j, k: (i, j)),
            scratch_shapes=[pltpu.VMEM((tm, tn), jnp.float32)],
        ),
        compiler_params=pltpu.CompilerParams(
            dimension_semantics=("parallel", "parallel", "arbitrary"),
            vmem_limit_bytes=VMEM_LIMIT),
    )(a_p, w_p, b_p)
    return out[:M, :n_valid]


def conv3x3_direct(x, w3, b, *, leaky_in, sc=None, out_dtype=jnp.bfloat16):
    """3x3 / pad=1 / stride=1 conv on NHWC input via shifted-window matmuls.

    x:  (N, H, W, Cin)   f32 or bf16
    w3: (9, Cin, Cout)   bf16   (tap order dy-major, dx-minor)
    b:  (1, Cout)        f32
    sc: optional (N, H, W, Cout) shortcut; output = (conv + sc) / sqrt(2)
    """
    N, H, W, Cin = x.shape
    _, _, Cout = w3.shape
    Hp, Wp = H + 2, W + 2
    n_rows = N * Hp * Wp
    Mo = _round_up(n_rows, 16)                 # 16: friendly to bf16 (16,128) tiling
    max_off = 2 * Wp + 2
    Mx = _round_up(Mo + max_off, 16)

    xp = jnp.pad(x, ((0, 0), (1, 1), (1, 1), (0, 0)))
    xf = jnp.pad(xp.reshape(n_rows, Cin), ((0, Mx - n_rows), (0, 0)))

    tc_out = 256 if Cout % 256 == 0 else Cout  # >=2 Cout blocks, modest weight tile
    taps = tuple(dy * Wp + dx for dy in range(3) for dx in range(3))
    fuse_sc = sc is not None

    inputs = [xf, w3, b]
    in_specs = [
        pl.BlockSpec((Mx, Cin), lambda j: (0, 0)),          # constant -> single DMA
        pl.BlockSpec((9, Cin, tc_out), lambda j: (0, 0, j)),
        pl.BlockSpec((1, tc_out), lambda j: (0, j)),
    ]
    if fuse_sc:
        scp = jnp.pad(sc, ((0, 0), (0, Hp - H), (0, Wp - W), (0, 0)))
        scf = jnp.pad(scp.reshape(n_rows, Cout), ((0, Mo - n_rows), (0, 0)))
        inputs.append(scf)
        in_specs.append(pl.BlockSpec((Mo, tc_out), lambda j: (0, j)))

    out = pl.pallas_call(
        partial(_conv3x3_kernel, taps=taps, leaky_in=leaky_in, fuse_sc=fuse_sc),
        out_shape=jax.ShapeDtypeStruct((Mo, Cout), out_dtype),
        grid_spec=pltpu.PrefetchScalarGridSpec(
            num_scalar_prefetch=0,
            grid=(Cout // tc_out,),
            in_specs=in_specs,
            out_specs=pl.BlockSpec((Mo, tc_out), lambda j: (0, j)),
            scratch_shapes=[pltpu.VMEM((Mx, Cin), jnp.bfloat16)],   # staged leaky(x)
        ),
        compiler_params=pltpu.CompilerParams(
            dimension_semantics=("parallel",),
            vmem_limit_bytes=VMEM_LIMIT),
    )(*inputs)
    # drop the padded-resolution garbage rows
    return out[:n_rows].reshape(N, Hp, Wp, Cout)[:, :H, :W, :]


# ----------------------------- conv / pool glue -----------------------------

def conv2d_mm(x, p, kh, kw, pad, *, leaky_in=False, out_dtype=jnp.float32):
    """Conv via (small) im2col + Pallas matmul.  Used only where im2col does not
    inflate traffic (3-channel stem, 1x1 shortcut, 4x4 head)."""
    N, H, W, C = x.shape
    xp = jnp.pad(x, ((0, 0), (pad, pad), (pad, pad), (0, 0))) if pad > 0 else x
    Ho = H + 2 * pad - kh + 1
    Wo = W + 2 * pad - kw + 1
    if kh == 1 and kw == 1:
        a = xp.reshape(N * Ho * Wo, C)
    else:
        patches = [xp[:, dy:dy + Ho, dx:dx + Wo, :]
                   for dy in range(kh) for dx in range(kw)]
        a = jnp.concatenate(patches, axis=-1).reshape(N * Ho * Wo, kh * kw * C)
    out = matmul_bias(a, p['w'], p['b'], p['cout'],
                      leaky_in=leaky_in, out_dtype=out_dtype)
    return out.reshape(N, Ho, Wo, p['cout'])


_DIRECT_OK = True   # flips to False if the direct kernel ever fails on this backend


def conv3x3(x, p, *, leaky_in, sc=None, out_dtype=jnp.bfloat16):
    """Direct shifted-window conv, with an im2col+matmul fallback probed at the
    real shapes (not a tiny proxy shape)."""
    global _DIRECT_OK
    if _DIRECT_OK:
        try:
            return conv3x3_direct(x, p['w'], p['b'], leaky_in=leaky_in, sc=sc,
                                  out_dtype=out_dtype)
        except Exception:
            _DIRECT_OK = False
    # Fallback: im2col + Pallas matmul (weight reshaped to (9*Cin, Cout)).
    cin, cout = p['w'].shape[1], p['w'].shape[2]
    kp, np_ = _round_up(9 * cin, 128), _round_up(cout, 128)
    w2 = jnp.pad(p['w'].reshape(9 * cin, cout), ((0, kp - 9 * cin), (0, np_ - cout)))
    b2 = jnp.pad(p['b'], ((0, 0), (0, np_ - cout)))
    p2 = {'w': w2, 'b': b2, 'cout': cout}
    r = conv2d_mm(x, p2, 3, 3, 1, leaky_in=leaky_in, out_dtype=jnp.float32)
    if sc is not None:
        r = (sc.astype(jnp.float32) + r) * INV_SQRT2
    return r.astype(out_dtype)


def avg_pool2(x):
    # F.avg_pool2d(x, 2): 2x2 window, stride 2.  Tiny plain-JAX glue (bf16).
    N, H, W, C = x.shape
    return x.reshape(N, H // 2, 2, W // 2, 2, C).mean(axis=(2, 4))


# ----------------------------- parameters -----------------------------

def _init_mm_conv(key, kh, kw, cin, cout, bias=True):
    """Matmul-path conv: weight pre-padded to (Kp, Np) and stored bf16."""
    k1, k2 = jax.random.split(key)
    fan_in = kh * kw * cin
    w = jax.random.normal(k1, (fan_in, cout), jnp.float32) / math.sqrt(fan_in)
    b = (jax.random.normal(k2, (cout,), jnp.float32) * 0.01) if bias \
        else jnp.zeros((cout,), jnp.float32)
    kp, np_ = _round_up(fan_in, 128), _round_up(cout, 128)
    return {
        'w': jnp.pad(w, ((0, kp - fan_in), (0, np_ - cout))).astype(jnp.bfloat16),
        'b': jnp.pad(b, (0, np_ - cout)).reshape(1, np_),
        'cout': cout,
    }


def _init_direct_conv(key, cin, cout):
    """Direct-conv path: weight stored as (9, Cin, Cout) bf16, tap order (dy,dx)."""
    k1, k2 = jax.random.split(key)
    fan_in = 9 * cin
    w = jax.random.normal(k1, (fan_in, cout), jnp.float32) / math.sqrt(fan_in)
    b = jax.random.normal(k2, (cout,), jnp.float32) * 0.01
    return {
        'w': w.reshape(9, cin, cout).astype(jnp.bfloat16),
        'b': b.reshape(1, cout),
    }


def _init_linear(key, cin, cout):
    k1, k2 = jax.random.split(key)
    w = jax.random.normal(k1, (cin, cout), jnp.float32) / math.sqrt(cin)
    b = jax.random.normal(k2, (cout,), jnp.float32) * 0.01
    return {'w': w, 'b': b}


def init_discriminator(key, img_size=16, num_domains=2, max_conv_dim=512):
    """Mirrors Discriminator.__init__ shape logic exactly."""
    dim_in = 2 ** 14 // img_size
    repeat_num = int(math.log2(img_size)) - 2
    keys = jax.random.split(key, 3 + repeat_num)
    params = {'conv0': _init_mm_conv(keys[0], 3, 3, 3, dim_in), 'blocks': []}
    for i in range(repeat_num):
        dim_out = min(dim_in * 2, max_conv_dim)
        bk = jax.random.split(keys[1 + i], 3)
        blk = {
            'conv1': _init_direct_conv(bk[0], dim_in, dim_in),
            'conv2': _init_direct_conv(bk[1], dim_in, dim_out),
            'learned_sc': dim_in != dim_out,
        }
        if blk['learned_sc']:
            blk['conv1x1'] = _init_mm_conv(bk[2], 1, 1, dim_in, dim_out, bias=False)
        params['blocks'].append(blk)
        dim_in = dim_out
    params['conv4'] = _init_mm_conv(keys[1 + repeat_num], 4, 4, dim_in, dim_in)
    params['convf'] = _init_linear(keys[2 + repeat_num], dim_in, num_domains)
    return params


# ----------------------------- forward -----------------------------

def resblk_forward(x, blk):
    # ResBlk(normalize=False, downsample=True); activations carried in bf16.
    sc = x
    if blk['learned_sc']:
        sc = conv2d_mm(sc, blk['conv1x1'], 1, 1, 0, out_dtype=jnp.bfloat16)
    sc = avg_pool2(sc)                                     # shortcut downsample
    r = conv3x3(x, blk['conv1'], leaky_in=True)            # actv + conv1 (fused)
    r = avg_pool2(r)                                       # residual downsample
    # actv + conv2, with (conv2 + shortcut)/sqrt(2) fused into the epilogue
    return conv3x3(r, blk['conv2'], leaky_in=True, sc=sc)


def discriminator_forward(params, x_nchw, y):
    # input is NCHW (PyTorch convention); transpose to NHWC internally.
    x = jnp.transpose(x_nchw, (0, 2, 3, 1)).astype(jnp.float32)
    x = conv2d_mm(x, params['conv0'], 3, 3, 1, out_dtype=jnp.bfloat16)  # from-RGB
    for blk in params['blocks']:
        x = resblk_forward(x, blk)
    x = conv2d_mm(x, params['conv4'], 4, 4, 0, leaky_in=True,
                  out_dtype=jnp.float32)                   # LeakyReLU + 4x4 head
    # Final LeakyReLU + 1x1 classifier + per-sample gather: tiny (N x C x D),
    # done in plain jnp -- a Pallas launch here is pure overhead.
    h = x.reshape(x.shape[0], -1).astype(jnp.float32)      # spatial is 1x1 here
    h = jnp.where(h >= 0, h, LEAKY_SLOPE * h)
    out = h @ params['convf']['w'] + params['convf']['b']  # (N, num_domains)
    idx = jnp.arange(out.shape[0])
    return out[idx, y.astype(jnp.int32)]                   # out[idx, y]


if __name__ == "__main__":
    key = jax.random.PRNGKey(0)
    kp, kx = jax.random.split(key)

    img_size = 16       # dim_in = 2**14 // 16 = 1024, two ResBlks
    num_domains = 2
    batch = 2

    params = init_discriminator(kp, img_size=img_size, num_domains=num_domains)
    x = jax.random.normal(kx, (batch, 3, img_size, img_size), jnp.float32)
    y = jnp.array([0, 1], dtype=jnp.int32)

    out = discriminator_forward(params, x, y)
    out = jax.block_until_ready(out)
    assert out.shape == (batch,) and out.dtype == jnp.float32
    print("KERNEL_OK")
</pallas_src>

<mosaic_0001>
module attributes {stable_mosaic.version = 11 : i64} {
  func.func @_matmul_bias_kernel(%arg0: i32, %arg1: i32, %arg2: i32, %arg3: memref<512x128xbf16, #tpu.memory_space<vmem>>, %arg4: memref<128x512xbf16, #tpu.memory_space<vmem>>, %arg5: memref<1x512xf32, #tpu.memory_space<vmem>>, %arg6: memref<512x512xbf16, #tpu.memory_space<vmem>>, %arg7: memref<512x512xf32, #tpu.memory_space<vmem>>) attributes {dimension_semantics = [#tpu.dimension_semantics<parallel>, #tpu.dimension_semantics<parallel>, #tpu.dimension_semantics<arbitrary>], iteration_bounds = array<i64: 1, 2, 1>, scalar_prefetch = 0 : i64, scratch_operands = 1 : i64, tpu.core_type = #tpu.core_type<tc>, window_params = [{transform_indices = @transform_0, window_bounds = array<i64: 512, 128>}, {transform_indices = @transform_1, window_bounds = array<i64: 128, 512>}, {transform_indices = @transform_2, window_bounds = array<i64: 1, 512>}, {transform_indices = @transform_3, window_bounds = array<i64: 512, 512>}]} {
    %c0_i32 = arith.constant 0 : i32
    %0 = arith.cmpi eq, %arg2, %c0_i32 : i32
    %1 = arith.extui %0 : i1 to i32
    %c0_i32_0 = arith.constant 0 : i32
    %2 = arith.cmpi ne, %1, %c0_i32_0 : i32
    scf.if %2 {
      %cst_10 = arith.constant 0.000000e+00 : f32
      %12 = vector.broadcast %cst_10 : f32 to vector<512x512xf32>
      %c0_11 = arith.constant 0 : index
      %c0_12 = arith.constant 0 : index
      %13 = vector.load %arg7[%c0_11, %c0_12] : memref<512x512xf32, #tpu.memory_space<vmem>>, vector<512x512xf32>
      tpu.vector_store %arg7[%c0_11, %c0_12], %12 {strides = array<i32>} : memref<512x512xf32, #tpu.memory_space<vmem>>, vector<512x512xf32>,
    } else {
    }
    %c0 = arith.constant 0 : index
    %c0_1 = arith.constant 0 : index
    %3 = vector.load %arg3[%c0, %c0_1] : memref<512x128xbf16, #tpu.memory_space<vmem>>, vector<512x128xbf16>
    %c0_2 = arith.constant 0 : index
    %c0_3 = arith.constant 0 : index
    %4 = vector.load %arg7[%c0_2, %c0_3] : memref<512x512xf32, #tpu.memory_space<vmem>>, vector<512x512xf32>
    %c0_4 = arith.constant 0 : index
    %c0_5 = arith.constant 0 : index
    %5 = vector.load %arg4[%c0_4, %c0_5] : memref<128x512xbf16, #tpu.memory_space<vmem>>, vector<128x512xbf16>
    %cst = arith.constant dense<0.000000e+00> : vector<512x512xf32>
    %6 = tpu.matmul %3, %5, %cst {dimension_numbers = #tpu.dot_dimension_numbers<[1], [0], [0], [1], [0, 0, 1, 1], [], []>} : vector<512x128xbf16>, vector<128x512xbf16>, vector<512x512xf32> -> vector<512x512xf32>
    %7 = arith.addf %4, %6 : vector<512x512xf32>
    %c0_6 = arith.constant 0 : index
    %c0_7 = arith.constant 0 : index
    %8 = vector.load %arg7[%c0_6, %c0_7] : memref<512x512xf32, #tpu.memory_space<vmem>>, vector<512x512xf32>
    tpu.vector_store %arg7[%c0_6, %c0_7], %7 {strides = array<i32>} : memref<512x512xf32, #tpu.memory_space<vmem>>, vector<512x512xf32>,
    %c0_i32_8 = arith.constant 0 : i32
    %9 = arith.cmpi eq, %arg2, %c0_i32_8 : i32
    %10 = arith.extui %9 : i1 to i32
    %c0_i32_9 = arith.constant 0 : i32
    %11 = arith.cmpi ne, %10, %c0_i32_9 : i32
    scf.if %11 {
      %c0_10 = arith.constant 0 : index
      %c0_11 = arith.constant 0 : index
      %12 = vector.load %arg7[%c0_10, %c0_11] : memref<512x512xf32, #tpu.memory_space<vmem>>, vector<512x512xf32>
      %c0_12 = arith.constant 0 : index
      %c0_13 = arith.constant 0 : index
      %13 = vector.load %arg5[%c0_12, %c0_13] : memref<1x512xf32, #tpu.memory_space<vmem>>, vector<1x512xf32>
      %14 = vector.broadcast %13 : vector<1x512xf32> to vector<512x512xf32>
      %15 = arith.addf %12, %14 : vector<512x512xf32>
      %16 = arith.truncf %15 : vector<512x512xf32> to vector<512x512xbf16>
      %c0_14 = arith.constant 0 : index
      %c0_15 = arith.constant 0 : index
      %17 = vector.load %arg6[%c0_14, %c0_15] : memref<512x512xbf16, #tpu.memory_space<vmem>>, vector<512x512xbf16>
      tpu.vector_store %arg6[%c0_14, %c0_15], %16 {strides = array<i32>} : memref<512x512xbf16, #tpu.memory_space<vmem>>, vector<512x512xbf16>,
    } else {
    }
    return
  }
  func.func @transform_0(%arg0: i32, %arg1: i32, %arg2: i32) -> (i32, i32) {
    %c0_i32 = arith.constant 0 : i32
    return %arg0, %arg2 : i32, i32
  }
  func.func @transform_1(%arg0: i32, %arg1: i32, %arg2: i32) -> (i32, i32) {
    %c0_i32 = arith.constant 0 : i32
    return %arg2, %arg1 : i32, i32
  }
  func.func @transform_2(%arg0: i32, %arg1: i32, %arg2: i32) -> (i32, i32) {
    %c0_i32 = arith.constant 0 : i32
    %c0_i32_0 = arith.constant 0 : i32
    return %c0_i32, %arg1 : i32, i32
  }
  func.func @transform_3(%arg0: i32, %arg1: i32, %arg2: i32) -> (i32, i32) {
    %c0_i32 = arith.constant 0 : i32
    return %arg0, %arg1 : i32, i32
  }
}

</mosaic_0001>

<bundles_post_ra>
// kernel: tpu_custom_call.1
= control target key start
LH: loop header
LB: loop body
LE: loop exit
PB: predicated region body
PF: predicated region fallthrough
CT: control target
= control target key end

     0   :  { %8 = vsyncpa [#allocation4], 0  ;;  %s5447_s0 = inlined_call_operand.hbm [shape: bf16[512,128], index: 0, kind: input, shape index: {}]   ;;  %s5448_s1 = inlined_call_operand.hbm [shape: bf16[128,1024], index: 1, kind: input, shape index: {}]   ;;  %s5449_s2 = inlined_call_operand.hbm [shape: f32[1,1024], index: 2, kind: input, shape index: {}]   ;;  %s5450_s3 = inlined_call_operand.hbm [shape: bf16[512,1024], index: 3, kind: output, shape index: {}]  }
   0x1   :  { %9 = vsyncpa [#allocation7], 0 }
   0x2   :  { %11 = vsyncpa [#allocation7 + $0x1], 0 }
   0x3   :  { %12 = vsyncpa [#allocation5], 0 }
   0x4   :  { %14 = vsyncpa [#allocation5 + $0x1], 0  ;;  %s4753_s12 = smov 0   ;;  %s4755_s13 = smov 0  }
   0x5   :  { %s4757_s14 = smov 0   ;;  %s4759_s15 = smov 0  }
   0x6   :  { %s4761_s16 = smov 0   ;;  %s4763_s17 = smov 0  }
   0x7 LB: > { %s35_s18 = sadd.s32 1, %s4714_s16  ;;  %s76_s19 = sadd.s32 1, %s4706_s14  ;;  %s4718_s17 = sphi %s4763_s17, %s20_s17   ;;  %s4714_s16 = sphi %s4761_s16, %s5470_s16   ;;  %s4710_s15 = sphi %s4759_s15, %s5469_s15   ;;  %s4706_s14 = sphi %s4757_s14, %s5468_s14   ;;  %s4702_s13 = sphi %s4755_s13, %s5467_s13   ;;  %s4698_s12 = sphi %s4753_s12, %s5466_s12  }
   0x8   : > { %p37_p0 = scmp.ge.s32.totalorder %s35_s18, 2  ;;  %p83_p1 = scmp.ne.s32.totalorder %s4706_s14, %s4702_s13 }
   0x9   : > { %p84_p2 = scmp.eq.s32.totalorder %s4718_s17, 0  ;;  %p4411_p5 = scmp.lt.s32.totalorder %s4718_s17, 2 }
   0xa   : > { %s5472_s18 = smov (%p37_p0, %s35_s18), 0  ;;  %s184_s21 = sand.u32 1, %s4718_s17  }
   0xb   : > { %p85_p4 = por %p84_p2, %p83_p1  ;;  %s72_s20 = ssub.s32 %s4714_s16, %s5472_s18 }
   0xc   : > { %p74_p6 = scmp.eq.s32.totalorder %s72_s20, 0  ;;  %s186_s22 = sand.u32 1, %s4706_s14  }
   0xd   : > { %s4254_s23 = sshll.u32 %s4714_s16, 8  ;;  %s4046_s25 = sshll.u32 %s186_s22, 8 }
   0xe   : > { %s4801_s24 = scalar_select %p74_p6, %s4706_s14, %s76_s19  }
   0xf   : > { %s197_s28 = scalar_lea.hbm %s5448_s1, %s4254_s23  ;;  %p4808_p7 = pnand %p4411_p5, %p85_p4 }
  0x10   : > { %s188_s30 = scalar_lea.vmem [#allocation6], %s4046_s25  ;;  %s4812_s5 = scalar_lea.sflag [#allocation7], %s184_s21 }
  0x11   : > { %s198_s4 = sshll.u32 %s188_s30, 4  ;;  %p5452_p8 = pneg %p4808_p7  ;;  %s199_s4 = int_to_ptr.vmem [resolvable:$true] %s198_s4 }
  0x12   : > { %s4565_s6 = scalar_lea.vmem %s199_s4, 4096  ;;  %s4720_s7 = smov [#allocation6]  }
  0x13   : > { %p4566_p9 = scmp.ne.s32.totalorder %s199_s4, %s4565_s6  ;;  %s4570_s8 = sshll.u32 %s4720_s7, 4  ;;  %s4571_s8 = int_to_ptr.vmem [resolvable:$false] %s4570_s8 }
  0x14   : > { %s4572_s9 = scalar_lea.vmem %s4571_s8, 8192  ;;  %p4573_p12 = scmp.lt.s32.totalorder %s199_s4, %s4571_s8 }
  0x15   : > { %p4568_p10 = pnand %p4566_p9, %p5452_p8  ;;  %p4574_p13 = scmp.lt.s32.totalorder %s4572_s9, %s4565_s6 }
  0x17   : > { %p4569_p11 = pneg %p4568_p10  ;;  %p4575_p0 = por %p4574_p13, %p4573_p12 }
  0x19   : > { %p4576_p2 = pnand %p4575_p0, %p4569_p11 }
  0x1b   : > { %4579 = shalt.err (!%p4576_p2)
}
  0x1c   : > { %s4721_s10 = smov 512   ;;  %s4722_s11 = smov 256  }
  0x1d   : > { %s4723_s19 = smov 16   ;;  %s4823_s20 = sadd.s32 4294967295, %s4718_s17  }
  0x1e   : > { %4402 = dma.hbm_to_vmem [thread:$0]  (!%p4808_p7), %s197_s28, 4096, %s199_s4, %s4812_s5, %s4721_s10, %s4722_s11, %s4723_s19  }
  0x1f   : > { %s4042_s21 = sadd.s32 4294967294, %s4718_s17   ;;  %p89_p4 = scmp.ne.s32.totalorder %s4702_s13, %s4698_s12 }
  0x20   : > { %p5451_p5 = scmp.eq.s32.totalorder %s4823_s20, 0  ;;  %p141_p6 = scmp.eq.s32.totalorder %s4823_s20, 1 }
  0x21   : > { %p147_p9 = scmp.eq.s32.totalorder %s4042_s21, 1  ;;  %p4043_p11 = scmp.ge.s32.totalorder %s4718_s17, 1 }
  0x22   : > { %p4832_p10 = por %p5451_p5, %p89_p4  ;;  %p4840_p12 = por %p141_p6, %p83_p1 }
  0x23   : > { %p4844_p13 = por %p147_p9, %p89_p4  ;;  %p154_p0 = scmp.lt.s32.totalorder %s4718_s17, 3 }
  0x24   : > { %s5456_s25 = scalar_select %p4840_p12, 1, 0 }
  0x25   : > { %s5457_s26 = scalar_select %p4844_p13, 1, 0 }
  0x26   : > { %p4849_p2 = pnand %p4043_p11, %p154_p0  ;;  %s4724_s28 = smov [#allocation3]  }
  0x27   : > { %s170_s30 = sshll.u32 %s4724_s28, 4  ;;  %s4049_s4 = sshll.u32 %s186_s22, 2  ;;  %s171_s30 = int_to_ptr.vmem [resolvable:$true] %s170_s30 }
  0x28   : > { %p4395_p3 = pneg %p4849_p2  ;;  %s4255_s6 = sshll.u32 %s4714_s16, 6 }
  0x29   : > { %s4867_s10 = scalar_lea.hbm %s5449_s2, %s4255_s6  ;;  %s212_s11 = scalar_lea.vmem [#allocation8], %s4049_s4 }
  0x2a   : > { %p4860_p1 = pnand %p4395_p3, %p5451_p5  ;;  %s220_s19 = sshll.u32 %s212_s11, 4  ;;  %s221_s19 = int_to_ptr.vmem [resolvable:$true] %s220_s19 }
  0x2b   : > { %s4591_s21 = scalar_lea.vmem %s171_s30, 4096  ;;  %p4599_p0 = scmp.lt.s32.totalorder %s171_s30, %s171_s30 }
  0x2c   : > { %p4582_p4 = pneg %p4860_p1  ;;  %p4592_p6 = scmp.ne.s32.totalorder %s171_s30, %s4591_s21 }
  0x2d   : > { %p4600_p3 = scmp.lt.s32.totalorder %s4591_s21, %s4591_s21 }
  0x2e   : > { %p4594_p9 = pnand %p4592_p6, %p4582_p4 }
  0x2f   : > { %p4601_p5 = por %p4600_p3, %p4599_p0 }
  0x30   : > { %p4595_p11 = pneg %p4594_p9 }
  0x32   : > { %p4602_p8 = pnand %p4601_p5, %p4595_p11 }
  0x34   : > { %4605 = shalt.err (!%p4602_p8)
}
  0x35   : > { %s4725_s22 = smov 64   ;;  %s4726_s28 = smov 4  }
  0x36   : > { %4398 = dma.hbm_to_vmem [thread:$0]  (!%p4860_p1), %s5447_s0, 4096, %s171_s30, [#allocation4], %s4725_s22, %s4725_s22, %s4726_s28  }
  0x37   : > { %s4619_s8 = scalar_lea.vmem %s221_s19, 64  ;;  %p5460_p12 = pneg %p4808_p7 }
  0x38   : > { %p4620_p13 = scmp.ne.s32.totalorder %s221_s19, %s4619_s8  ;;  %s4727_s9 = smov [#allocation8]  }
  0x39   : > { %s4624_s11 = sshll.u32 %s4727_s9, 4  ;;  %s4625_s11 = int_to_ptr.vmem [resolvable:$false] %s4624_s11 }
  0x3a   : > { %p4622_p4 = pnand %p4620_p13, %p5460_p12  ;;  %s4626_s21 = scalar_lea.vmem %s4625_s11, 128 }
  0x3b   : > { %p4627_p8 = scmp.lt.s32.totalorder %s221_s19, %s4625_s11  ;;  %p4628_p5 = scmp.lt.s32.totalorder %s4626_s21, %s4619_s8 }
  0x3c   : > { %p4623_p6 = pneg %p4622_p4 }
  0x3d   : > { %p4629_p9 = por %p4628_p5, %p4627_p8 }
  0x3f   : > { %p4630_p11 = pnand %p4629_p9, %p4623_p6 }
  0x41   : > { %4633 = shalt.err (!%p4630_p11)
}
  0x42   : > { %4405 = dma.hbm_to_vmem [thread:$0]  (!%p4808_p7), %s4867_s10, 64, %s221_s19, %s4812_s5  }
  0x43   : > { %229 = sbr.rel (%p4849_p2) target bundleno = 577 (0x241), region = 32  ;;  %p5461_p12 = scmp.eq.s32.totalorder (!%p4849_p2), %s4823_s20, 0 }
  0x48   : > { %4685 = dma.done.wait (%p5461_p12), [#allocation4], 4096   ;;  %p5462_p13 = pmov %p5461_p12 }
  0x49   : > { %s235_s30 = sand.u32 1, %s4823_s20   ;;  %s4891_s7 = sand.u32 1, %s4702_s13  }
  0x4a   : > { %4687 = vsyncadd (%p5462_p13), [#allocation4], 4294963200  ;;  %s4054_s29 = sshll.u32 %s4891_s7, 8  ;;  %s236_s22 = scalar_lea.sflag [#allocation7], %s235_s30 }
  0x4b   : > { %s4894_s28 = scalar_lea.vmem [#allocation6], %s4054_s29 }
  0x4c   : > { %4689 = dma.done.wait (%p4832_p10), %s236_s22, 4160  }
  0x4d   : > { %4691 = vsyncadd (%p4832_p10), %s236_s22, 4294963136  ;;  %v4728_v0 = vmov 0   ;;  %v4472_v1 = vld [vmem:[%s4894_s28 + $0xe4] ss:$16 sps:$4 sm:$0xff]   ;;  %v4474_v2 = vld [vmem:[%s4894_s28 + $0xec] ss:$16 sps:$4 sm:$0xff]   ;;  %v2726_v56 = vlaneseq }
  0x4e   : > { %1279 = vmatprep.mubr.bf16.mxu0 %v4728_v0  ;;  %1632 = vmatprep.mubr.bf16.mxu1 %v4728_v0  ;;  %v4476_v3 = vld [vmem:[%s4894_s28 + $0xe0] ss:$16 sps:$4 sm:$0xff]   ;;  %v4477_v4 = vld [vmem:[%s4894_s28 + $0xe8] ss:$16 sps:$4 sm:$0xff]   ;;  %v4478_v5 = vld [vmem:[%s4894_s28 + $0xc4] ss:$16 sps:$4 sm:$0xff]  }
  0x4f   : > { %1247 = vmatprep.subr.bf16.mxu0 %v4472_v1  ;;  %1600 = vmatprep.subr.bf16.mxu1 %v4474_v2  ;;  %v4480_v6 = vld [vmem:[%s4894_s28 + $0xcc] ss:$16 sps:$4 sm:$0xff]   ;;  %v4482_v7 = vld [vmem:[%s4894_s28 + $0xc0] ss:$16 sps:$4 sm:$0xff]   ;;  %v4483_v8 = vld [vmem:[%s4894_s28 + $0xc8] ss:$16 sps:$4 sm:$0xff]  }
  0x50   : > { %1248 = vmatpush1.bf16.msra.mxu0 %v4476_v3  ;;  %1601 = vmatpush1.bf16.msra.mxu1 %v4477_v4  ;;  %v4484_v9 = vld [vmem:[%s4894_s28 + $0xa4] ss:$16 sps:$4 sm:$0xff]   ;;  %v4486_v10 = vld [vmem:[%s4894_s28 + $0xac] ss:$16 sps:$4 sm:$0xff]   ;;  %v4488_v11 = vld [vmem:[%s4894_s28 + $0xa0] ss:$16 sps:$4 sm:$0xff]  }
  0x51   : > { %1249 = vmatprep.subr.bf16.mxu0 %v4478_v5  ;;  %1602 = vmatprep.subr.bf16.mxu1 %v4480_v6  ;;  %v4489_v12 = vld [vmem:[%s4894_s28 + $0xa8] ss:$16 sps:$4 sm:$0xff]   ;;  %v4490_v13 = vld [vmem:[%s4894_s28 + $0x84] ss:$16 sps:$4 sm:$0xff]   ;;  %v4492_v14 = vld [vmem:[%s4894_s28 + $0x8c] ss:$16 sps:$4 sm:$0xff]  }
  0x52   : > { %v4494_v15 = vld [vmem:[%s4894_s28 + $0x80] ss:$16 sps:$4 sm:$0xff]   ;;  %v4495_v16 = vld [vmem:[%s4894_s28 + $0x88] ss:$16 sps:$4 sm:$0xff]   ;;  %v4496_v17 = vld [vmem:[%s4894_s28 + $0x64] ss:$16 sps:$4 sm:$0xff]  }
  0x53   : > { %v4498_v18 = vld [vmem:[%s4894_s28 + $0x6c] ss:$16 sps:$4 sm:$0xff]   ;;  %v4500_v19 = vld [vmem:[%s4894_s28 + $0x60] ss:$16 sps:$4 sm:$0xff]   ;;  %v4501_v20 = vld [vmem:[%s4894_s28 + $0x68] ss:$16 sps:$4 sm:$0xff]  }
  0x54   : > { %1250 = vmatpush1.bf16.msra.mxu0 %v4482_v7  ;;  %1603 = vmatpush1.bf16.msra.mxu1 %v4483_v8  ;;  %v4502_v21 = vld [vmem:[%s4894_s28 + $0x44] ss:$16 sps:$4 sm:$0xff]   ;;  %v4504_v22 = vld [vmem:[%s4894_s28 + $0x4c] ss:$16 sps:$4 sm:$0xff]   ;;  %v4506_v23 = vld [vmem:[%s4894_s28 + $0x40] ss:$16 sps:$4 sm:$0xff]  }
  0x55   : > { %1251 = vmatprep.subr.bf16.mxu0 %v4484_v9  ;;  %1604 = vmatprep.subr.bf16.mxu1 %v4486_v10  ;;  %v4507_v24 = vld [vmem:[%s4894_s28 + $0x48] ss:$16 sps:$4 sm:$0xff]   ;;  %v4508_v25 = vld [vmem:[%s4894_s28 + $0x24] ss:$16 sps:$4 sm:$0xff]   ;;  %v4510_v26 = vld [vmem:[%s4894_s28 + $0x2c] ss:$16 sps:$4 sm:$0xff]  }
  0x56   : > { %v4512_v27 = vld [vmem:[%s4894_s28 + $0x20] ss:$16 sps:$4 sm:$0xff]   ;;  %v4513_v28 = vld [vmem:[%s4894_s28 + $0x28] ss:$16 sps:$4 sm:$0xff]   ;;  %v4514_v29 = vld [vmem:[%s4894_s28 + $0x4] ss:$16 sps:$4 sm:$0xff]  }
  0x57   : > { %v4516_v30 = vld [vmem:[%s4894_s28 + $0xc] ss:$16 sps:$4 sm:$0xff]   ;;  %v4518_v31 = vld [vmem:[%s4894_s28] ss:$16 sps:$4 sm:$0xff]   ;;  %v4519_v32 = vld [vmem:[%s4894_s28 + $0x8] ss:$16 sps:$4 sm:$0xff]  }
  0x58   : > { %1252 = vmatpush1.bf16.msra.mxu0 %v4488_v11  ;;  %1605 = vmatpush1.bf16.msra.mxu1 %v4489_v12  ;;  %v4520_v33 = vld [vmem:[#allocation3] sm:$0xff]   ;;  %v4521_v34 = vld [vmem:[#allocation3 + $0x8] sm:$0xff]   ;;  %v4522_v35 = vld [vmem:[#allocation3 + $0x10] sm:$0xff]   ;;  %s4055_s5 = sshll.u32 %s4891_s7, 2  ;;  %v2727_v58 = vshrl.u32 %v2726_v56, 7  ;;  %s4056_s23 = sshll.u32 %s4891_s7, 10 }
  0x59   : > { %1253 = vmatprep.subr.bf16.mxu0 %v4490_v13  ;;  %1606 = vmatprep.subr.bf16.mxu1 %v4492_v14  ;;  %v4523_v36 = vld [vmem:[#allocation3 + $0x18] sm:$0xff]   ;;  %v4524_v37 = vld [vmem:[#allocation3 + $0x20] sm:$0xff]   ;;  %v4525_v38 = vld [vmem:[#allocation3 + $0x28] sm:$0xff]   ;;  %s248_s20 = scalar_lea.vmem [#allocation8], %s4055_s5  ;;  %s4998_s27 = scalar_lea.vmem [#allocation9], %s4056_s23 }
  0x5a   : > { %v4526_v39 = vld [vmem:[#allocation3 + $0x30] sm:$0xff]   ;;  %v4527_v40 = vld [vmem:[#allocation3 + $0x38] sm:$0xff]   ;;  %v4528_v41 = vld [vmem:[#allocation3 + $0x40] sm:$0xff]   ;;  %v2728_v59 = vsub.s32 0, %v2727_v58  ;;  %v2736_v60 = vsub.s32 2, %v2727_v58  ;;  %v2732_v61 = vsub.s32 1, %v2727_v58 }
  0x5b   : > { %v4529_v42 = vld [vmem:[#allocation3 + $0x48] sm:$0xff]   ;;  %v4530_v43 = vld [vmem:[#allocation3 + $0x50] sm:$0xff]   ;;  %v4531_v44 = vld [vmem:[#allocation3 + $0x58] sm:$0xff]   ;;  %v2740_v62 = vsub.s32 3, %v2727_v58  ;;  %s4384_s10 = sshll.u32 %s4710_s15, 8  ;;  %s3915_s19 = sshll.u32 %s4998_s27, 4  ;;  %s5397_s19 = int_to_ptr.vmem [resolvable:$true] %s3915_s19 }
  0x5c   : > { %1254 = vmatpush1.bf16.msra.mxu0 %v4494_v15  ;;  %1607 = vmatpush1.bf16.msra.mxu1 %v4495_v16  ;;  %v4532_v45 = vld [vmem:[#allocation3 + $0x60] sm:$0xff]   ;;  %v4533_v46 = vld [vmem:[#allocation3 + $0x68] sm:$0xff]   ;;  %v4534_v47 = vld [vmem:[#allocation3 + $0x70] sm:$0xff]   ;;  %s5395_s4 = scalar_lea.hbm %s5450_s3, %s4384_s10  ;;  %s3899_s8 = scalar_lea.sflag [#allocation5], %s4891_s7 }
  0x5d   : > { %1255 = vmatprep.subr.bf16.mxu0 %v4496_v17  ;;  %1608 = vmatprep.subr.bf16.mxu1 %v4498_v18  ;;  %v4535_v48 = vld [vmem:[#allocation3 + $0x78] sm:$0xff]   ;;  %v4536_v49 = vld [vmem:[#allocation3 + $0x80] sm:$0xff]   ;;  %v4537_v50 = vld [vmem:[#allocation3 + $0x88] sm:$0xff]   ;;  %s4634_s9 = scalar_lea.vmem %s5397_s19, 16384  ;;  %p5463_p10 = scmp.ne.s32.totalorder %s5456_s25, 0 }
  0x5e   : > { %v4538_v51 = vld [vmem:[#allocation3 + $0x90] sm:$0xff]   ;;  %v4539_v52 = vld [vmem:[#allocation3 + $0x98] sm:$0xff]   ;;  %v4540_v53 = vld [vmem:[#allocation3 + $0xa0] sm:$0xff]   ;;  %p4635_p7 = scmp.ne.s32.totalorder %s5397_s19, %s4634_s9  ;;  %s4729_s11 = smov [#allocation9]  }
  0x5f   : > { %v4541_v54 = vld [vmem:[#allocation3 + $0xa8] sm:$0xff]   ;;  %v4542_v55 = vld [vmem:[#allocation3 + $0xb0] sm:$0xff]   ;;  %v4543_v57 = vld [vmem:[#allocation3 + $0xb8] sm:$0xff]   ;;  %s4638_s21 = sshll.u32 %s4729_s11, 4  ;;  %s4639_s21 = int_to_ptr.vmem [resolvable:$false] %s4638_s21 }
  0x60   : > { %1256 = vmatpush1.bf16.msra.mxu0 %v4500_v19  ;;  %1609 = vmatpush1.bf16.msra.mxu1 %v4501_v20  ;;  %v2724_v63 = vld [vmem:[%s248_s20] sm:$0xf]  ;;  %v4545_v16 = vld [vmem:[#allocation3 + $0xc8] sm:$0xff]   ;;  %v4547_v58 = vld [vmem:[#allocation3 + $0xd8] sm:$0xff]   ;;  %p4636_p2 = pnand %p4635_p7, %p5463_p10  ;;  %s4640_s30 = scalar_lea.vmem %s4639_s21, 32768 }
  0x61   : > { %1257 = vmatprep.subr.bf16.mxu0 %v4502_v21  ;;  %1610 = vmatprep.subr.bf16.mxu1 %v4504_v22  ;;  %v4544_v1 = vld [vmem:[#allocation3 + $0xc0] sm:$0xff]   ;;  %v4983_v2 = vrot.slane %v2724_v63, %v2728_v59  ;;  %v4985_v3 = vrot.slane %v2724_v63, %v2736_v60  ;;  %v4987_v4 = vrot.slane %v2724_v63, %v2732_v61  ;;  %p4641_p0 = scmp.lt.s32.totalorder %s5397_s19, %s4639_s21  ;;  %p4642_p3 = scmp.lt.s32.totalorder %s4640_s30, %s4634_s9 }
  0x62   : > { %v4989_v5 = vrot.slane %v2724_v63, %v2740_v62  ;;  %p4637_p1 = pneg %p4636_p2 }
  0x63   : > { %p4643_p4 = por %p4642_p3, %p4641_p0 }
  0x64   : > { %1258 = vmatpush1.bf16.msra.mxu0 %v4506_v23  ;;  %1611 = vmatpush1.bf16.msra.mxu1 %v4507_v24 }
  0x65   : > { %1259 = vmatprep.subr.bf16.mxu0 %v4508_v25  ;;  %1612 = vmatprep.subr.bf16.mxu1 %v4510_v26  ;;  %p4644_p6 = pnand %p4643_p4, %p4637_p1 }
  0x68   : > { %1260 = vmatpush1.bf16.msra.mxu0 %v4512_v27  ;;  %1613 = vmatpush1.bf16.msra.mxu1 %v4513_v28 }
  0x69   : > { %1261 = vmatprep.subr.bf16.mxu0 %v4514_v29  ;;  %1614 = vmatprep.subr.bf16.mxu1 %v4516_v30 }
  0x6c   : > { %1262 = vmatpush1.bf16.msra.mxu0 %v4518_v31  ;;  %1615 = vmatpush1.bf16.msra.mxu1 %v4519_v32 }
  0x6f   : > { %1280 = vmatmul.mubr.bf16.vlgmr.msra.gmra.mxu0 %v4520_v33  ;;  %1633 = vmatmul.mubr.bf16.vlgmr.msra.gmra.mxu1 %v4520_v33 }
  0x70   : > { %1289 = vmatprep.mubr.bf16.mxu0 %v4728_v0  ;;  %1642 = vmatprep.mubr.bf16.mxu1 %v4728_v0 }
  0x77   : > { %1290 = vmatmul.mubr.bf16.gmra.mxu0 %v4521_v34  ;;  %1643 = vmatmul.mubr.bf16.gmra.mxu1 %v4521_v34 }
  0x78   : > { %1299 = vmatprep.mubr.bf16.mxu0 %v4728_v0  ;;  %1652 = vmatprep.mubr.bf16.mxu1 %v4728_v0 }
  0x7f   : > { %1300 = vmatmul.mubr.bf16.gmra.mxu0 %v4522_v35  ;;  %1653 = vmatmul.mubr.bf16.gmra.mxu1 %v4522_v35 }
  0x80   : > { %1309 = vmatprep.mubr.bf16.mxu0 %v4728_v0  ;;  %1662 = vmatprep.mubr.bf16.mxu1 %v4728_v0 }
  0x87   : > { %1310 = vmatmul.mubr.bf16.gmra.mxu0 %v4523_v36  ;;  %1663 = vmatmul.mubr.bf16.gmra.mxu1 %v4523_v36 }
  0x88   : > { %1319 = vmatprep.mubr.bf16.mxu0 %v4728_v0  ;;  %1672 = vmatprep.mubr.bf16.mxu1 %v4728_v0 }
  0x8f   : > { %1320 = vmatmul.mubr.bf16.gmra.mxu0 %v4524_v37  ;;  %1673 = vmatmul.mubr.bf16.gmra.mxu1 %v4524_v37  ;;  %v4546_v37 = vld [vmem:[#allocation3 + $0xd0] sm:$0xff]  }
  0x90   : > { %1329 = vmatprep.mubr.bf16.mxu0 %v4728_v0  ;;  %1682 = vmatprep.mubr.bf16.mxu1 %v4728_v0 }
  0x97   : > { %1330 = vmatmul.mubr.bf16.gmra.mxu0 %v4525_v38  ;;  %1683 = vmatmul.mubr.bf16.gmra.mxu1 %v4525_v38 }
  0x98   : > { %1339 = vmatprep.mubr.bf16.mxu0 %v4728_v0  ;;  %1692 = vmatprep.mubr.bf16.mxu1 %v4728_v0 }
  0x9f   : > { %1340 = vmatmul.mubr.bf16.gmra.mxu0 %v4526_v39  ;;  %1693 = vmatmul.mubr.bf16.gmra.mxu1 %v4526_v39 }
  0xa0   : > { %1349 = vmatprep.mubr.bf16.mxu0 %v4728_v0  ;;  %1702 = vmatprep.mubr.bf16.mxu1 %v4728_v0 }
  0xa7   : > { %1350 = vmatmul.mubr.bf16.gmra.mxu0 %v4527_v40  ;;  %1703 = vmatmul.mubr.bf16.gmra.mxu1 %v4527_v40 }
  0xa8   : > { %1359 = vmatprep.mubr.bf16.mxu0 %v4728_v0  ;;  %1712 = vmatprep.mubr.bf16.mxu1 %v4728_v0 }
  0xaf   : > { %1360 = vmatmul.mubr.bf16.gmra.mxu0 %v4528_v41  ;;  %1713 = vmatmul.mubr.bf16.gmra.mxu1 %v4528_v41 }
  0xb0   : > { %1369 = vmatprep.mubr.bf16.mxu0 %v4728_v0  ;;  %1722 = vmatprep.mubr.bf16.mxu1 %v4728_v0 }
  0xb7   : > { %1370 = vmatmul.mubr.bf16.gmra.mxu0 %v4529_v42  ;;  %1723 = vmatmul.mubr.bf16.gmra.mxu1 %v4529_v42 }
  0xb8   : > { %1379 = vmatprep.mubr.bf16.mxu0 %v4728_v0  ;;  %1732 = vmatprep.mubr.bf16.mxu1 %v4728_v0 }
  0xbf   : > { %1380 = vmatmul.mubr.bf16.gmra.mxu0 %v4530_v43  ;;  %1733 = vmatmul.mubr.bf16.gmra.mxu1 %v4530_v43 }
  0xc0   : > { %1389 = vmatprep.mubr.bf16.mxu0 %v4728_v0  ;;  %1742 = vmatprep.mubr.bf16.mxu1 %v4728_v0 }
  0xc7   : > { %1390 = vmatmul.mubr.bf16.gmra.mxu0 %v4531_v44  ;;  %1743 = vmatmul.mubr.bf16.gmra.mxu1 %v4531_v44 }
  0xc8   : > { %1399 = vmatprep.mubr.bf16.mxu0 %v4728_v0  ;;  %1752 = vmatprep.mubr.bf16.mxu1 %v4728_v0 }
  0xcf   : > { %1400 = vmatmul.mubr.bf16.gmra.mxu0 %v4532_v45  ;;  %1753 = vmatmul.mubr.bf16.gmra.mxu1 %v4532_v45 }
  0xd0   : > { %1409 = vmatprep.mubr.bf16.mxu0 %v4728_v0  ;;  %1762 = vmatprep.mubr.bf16.mxu1 %v4728_v0 }
  0xd7   : > { %1410 = vmatmul.mubr.bf16.gmra.mxu0 %v4533_v46  ;;  %1763 = vmatmul.mubr.bf16.gmra.mxu1 %v4533_v46 }
  0xd8   : > { %1419 = vmatprep.mubr.bf16.mxu0 %v4728_v0  ;;  %1772 = vmatprep.mubr.bf16.mxu1 %v4728_v0 }
  0xdf   : > { %1420 = vmatmul.mubr.bf16.gmra.mxu0 %v4534_v47  ;;  %1773 = vmatmul.mubr.bf16.gmra.mxu1 %v4534_v47 }
  0xe0   : > { %1429 = vmatprep.mubr.bf16.mxu0 %v4728_v0  ;;  %1782 = vmatprep.mubr.bf16.mxu1 %v4728_v0 }
  0xe7   : > { %1430 = vmatmul.mubr.bf16.gmra.mxu0 %v4535_v48  ;;  %1783 = vmatmul.mubr.bf16.gmra.mxu1 %v4535_v48 }
  0xe8   : > { %1439 = vmatprep.mubr.bf16.mxu0 %v4728_v0  ;;  %1792 = vmatprep.mubr.bf16.mxu1 %v4728_v0 }
  0xef   : > { %1440 = vmatmul.mubr.bf16.gmra.mxu0 %v4536_v49  ;;  %1793 = vmatmul.mubr.bf16.gmra.mxu1 %v4536_v49 }
  0xf0   : > { %1449 = vmatprep.mubr.bf16.mxu0 %v4728_v0  ;;  %1802 = vmatprep.mubr.bf16.mxu1 %v4728_v0 }
  0xf7   : > { %1450 = vmatmul.mubr.bf16.gmra.mxu0 %v4537_v50  ;;  %1803 = vmatmul.mubr.bf16.gmra.mxu1 %v4537_v50 }
  0xf8   : > { %1459 = vmatprep.mubr.bf16.mxu0 %v4728_v0  ;;  %1812 = vmatprep.mubr.bf16.mxu1 %v4728_v0 }
  0xff   : > { %1460 = vmatmul.mubr.bf16.gmra.mxu0 %v4538_v51  ;;  %1813 = vmatmul.mubr.bf16.gmra.mxu1 %v4538_v51 }
 0x100   : > { %1469 = vmatprep.mubr.bf16.mxu0 %v4728_v0  ;;  %1822 = vmatprep.mubr.bf16.mxu1 %v4728_v0 }
 0x107   : > { %1470 = vmatmul.mubr.bf16.gmra.mxu0 %v4539_v52  ;;  %1823 = vmatmul.mubr.bf16.gmra.mxu1 %v4539_v52 }
 0x108   : > { %1479 = vmatprep.mubr.bf16.mxu0 %v4728_v0  ;;  %1832 = vmatprep.mubr.bf16.mxu1 %v4728_v0 }
 0x10f   : > { %1480 = vmatmul.mubr.bf16.gmra.mxu0 %v4540_v53  ;;  %1833 = vmatmul.mubr.bf16.gmra.mxu1 %v4540_v53 }
 0x110   : > { %1489 = vmatprep.mubr.bf16.mxu0 %v4728_v0  ;;  %1842 = vmatprep.mubr.bf16.mxu1 %v4728_v0 }
 0x117   : > { %1490 = vmatmul.mubr.bf16.gmra.mxu0 %v4541_v54  ;;  %1843 = vmatmul.mubr.bf16.gmra.mxu1 %v4541_v54 }
 0x118   : > { %1499 = vmatprep.mubr.bf16.mxu0 %v4728_v0  ;;  %1852 = vmatprep.mubr.bf16.mxu1 %v4728_v0 }
 0x11f   : > { %1500 = vmatmul.mubr.bf16.gmra.mxu0 %v4542_v55  ;;  %1853 = vmatmul.mubr.bf16.gmra.mxu1 %v4542_v55 }
 0x120   : > { %1509 = vmatprep.mubr.bf16.mxu0 %v4728_v0  ;;  %1862 = vmatprep.mubr.bf16.mxu1 %v4728_v0 }
 0x127   : > { %1510 = vmatmul.mubr.bf16.gmra.mxu0 %v4543_v57  ;;  %1863 = vmatmul.mubr.bf16.gmra.mxu1 %v4543_v57 }
 0x128   : > { %1519 = vmatprep.mubr.bf16.mxu0 %v4728_v0  ;;  %1872 = vmatprep.mubr.bf16.mxu1 %v4728_v0 }
 0x12f   : > { %v1281_v6 = vpop.f32.mrf.mxu0  ;;  %1520 = vmatmul.mubr.bf16.gmra.mxu0 %v4544_v1  ;;  %v1634_v7 = vpop.f32.mrf.mxu1  ;;  %1873 = vmatmul.mubr.bf16.gmra.mxu1 %v4544_v1 }
 0x130   : > { %1529 = vmatprep.mubr.bf16.mxu0 %v4728_v0  ;;  %1882 = vmatprep.mubr.bf16.mxu1 %v4728_v0  ;;  %v2746_v10 = vadd.f32 %v4983_v2, %v1281_v6  ;;  %v2748_v11 = vadd.f32 %v4985_v3, %v1634_v7 }
 0x131   : > { %v1283_v8 = vpop.f32.mrf.mxu0  ;;  %v1636_v9 = vpop.f32.mrf.mxu1 }
 0x132   : > { %v2747_v12 = vadd.f32 %v4987_v4, %v1283_v8  ;;  %v2749_v13 = vadd.f32 %v4989_v5, %v1636_v9 }
 0x133   : > { %v1285_v14 = vpop.f32.mrf.mxu0  ;;  %v1638_v15 = vpop.f32.mrf.mxu1 }
 0x134   : > { %v4256_v17 = vpack.c.bf16 %v2747_v12, %v2746_v10  ;;  %v4257_v18 = vpack.c.bf16 %v2749_v13, %v2748_v11  ;;  %v2750_v21 = vadd.f32 %v4983_v2, %v1285_v14  ;;  %v2752_v22 = vadd.f32 %v4985_v3, %v1638_v15 }
 0x135   : > { %v1287_v19 = vpop.f32.mrf.mxu0  ;;  %v1640_v20 = vpop.f32.mrf.mxu1 }
 0x136   : > { %3770 = vst [vmem:[%s4998_s27] sm:$0xff] %v4256_v17  ;;  %3771 = vst [vmem:[%s4998_s27 + $0x8] sm:$0xff] %v4257_v18  ;;  %v2751_v23 = vadd.f32 %v4987_v4, %v1287_v19  ;;  %v2753_v24 = vadd.f32 %v4989_v5, %v1640_v20  ;;  %v4548_v20 = vld [vmem:[#allocation3 + $0xe0] sm:$0xff]  }
 0x137   : > { %v1291_v25 = vpop.f32.mrf.mxu0  ;;  %1530 = vmatmul.mubr.bf16.gmra.mxu0 %v4545_v16  ;;  %v1644_v26 = vpop.f32.mrf.mxu1  ;;  %1883 = vmatmul.mubr.bf16.gmra.mxu1 %v4545_v16 }
 0x138   : > { %v4258_v27 = vpack.c.bf16 %v2751_v23, %v2750_v21  ;;  %v4259_v28 = vpack.c.bf16 %v2753_v24, %v2752_v22  ;;  %1539 = vmatprep.mubr.bf16.mxu0 %v4728_v0  ;;  %1892 = vmatprep.mubr.bf16.mxu1 %v4728_v0  ;;  %v2754_v31 = vadd.f32 %v4983_v2, %v1291_v25 }
 0x139   : > { %v1293_v29 = vpop.f32.mrf.mxu0  ;;  %v1646_v30 = vpop.f32.mrf.mxu1  ;;  %v2756_v32 = vadd.f32 %v4985_v3, %v1644_v26 }
 0x13a   : > { %3772 = vst [vmem:[%s4998_s27 + $0x10] sm:$0xff] %v4258_v27  ;;  %3773 = vst [vmem:[%s4998_s27 + $0x18] sm:$0xff] %v4259_v28  ;;  %v2755_v33 = vadd.f32 %v4987_v4, %v1293_v29  ;;  %v2757_v34 = vadd.f32 %v4989_v5, %v1646_v30 }
 0x13b   : > { %v1295_v35 = vpop.f32.mrf.mxu0  ;;  %v1648_v36 = vpop.f32.mrf.mxu1 }
 0x13c   : > { %v4260_v38 = vpack.c.bf16 %v2755_v33, %v2754_v31  ;;  %v4261_v39 = vpack.c.bf16 %v2757_v34, %v2756_v32  ;;  %v2758_v42 = vadd.f32 %v4983_v2, %v1295_v35  ;;  %v2760_v43 = vadd.f32 %v4985_v3, %v1648_v36 }
 0x13d   : > { %v1297_v40 = vpop.f32.mrf.mxu0  ;;  %v1650_v41 = vpop.f32.mrf.mxu1 }
 0x13e   : > { %3774 = vst [vmem:[%s4998_s27 + $0x20] sm:$0xff] %v4260_v38  ;;  %3775 = vst [vmem:[%s4998_s27 + $0x28] sm:$0xff] %v4261_v39  ;;  %v2759_v44 = vadd.f32 %v4987_v4, %v1297_v40  ;;  %v2761_v45 = vadd.f32 %v4989_v5, %v1650_v41  ;;  %v4549_v41 = vld [vmem:[#allocation3 + $0xe8] sm:$0xff]  }
 0x13f   : > { %v1301_v46 = vpop.f32.mrf.mxu0  ;;  %1540 = vmatmul.mubr.bf16.gmra.mxu0 %v4546_v37  ;;  %v1654_v47 = vpop.f32.mrf.mxu1  ;;  %1893 = vmatmul.mubr.bf16.gmra.mxu1 %v4546_v37 }
 0x140   : > { %v4262_v48 = vpack.c.bf16 %v2759_v44, %v2758_v42  ;;  %v4263_v49 = vpack.c.bf16 %v2761_v45, %v2760_v43  ;;  %1549 = vmatprep.mubr.bf16.mxu0 %v4728_v0  ;;  %1902 = vmatprep.mubr.bf16.mxu1 %v4728_v0  ;;  %v2762_v52 = vadd.f32 %v4983_v2, %v1301_v46 }
 0x141   : > { %v1303_v50 = vpop.f32.mrf.mxu0  ;;  %v1656_v51 = vpop.f32.mrf.mxu1  ;;  %v2764_v53 = vadd.f32 %v4985_v3, %v1654_v47 }
 0x142   : > { %3776 = vst [vmem:[%s4998_s27 + $0x30] sm:$0xff] %v4262_v48  ;;  %3777 = vst [vmem:[%s4998_s27 + $0x38] sm:$0xff] %v4263_v49  ;;  %v2763_v54 = vadd.f32 %v4987_v4, %v1303_v50  ;;  %v2765_v55 = vadd.f32 %v4989_v5, %v1656_v51 }
 0x143   : > { %v1305_v56 = vpop.f32.mrf.mxu0  ;;  %v1658_v57 = vpop.f32.mrf.mxu1 }
 0x144   : > { %v4264_v59 = vpack.c.bf16 %v2763_v54, %v2762_v52  ;;  %v4265_v60 = vpack.c.bf16 %v2765_v55, %v2764_v53  ;;  %v2766_v63 = vadd.f32 %v4983_v2, %v1305_v56  ;;  %v2768_v1 = vadd.f32 %v4985_v3, %v1658_v57 }
 0x145   : > { %v1307_v61 = vpop.f32.mrf.mxu0  ;;  %v1660_v62 = vpop.f32.mrf.mxu1 }
 0x146   : > { %3778 = vst [vmem:[%s4998_s27 + $0x40] sm:$0xff] %v4264_v59  ;;  %3779 = vst [vmem:[%s4998_s27 + $0x48] sm:$0xff] %v4265_v60  ;;  %v2767_v6 = vadd.f32 %v4987_v4, %v1307_v61  ;;  %v2769_v7 = vadd.f32 %v4989_v5, %v1660_v62  ;;  %v4550_v62 = vld [vmem:[#allocation3 + $0xf0] sm:$0xff]  }
 0x147   : > { %v1311_v8 = vpop.f32.mrf.mxu0  ;;  %1550 = vmatmul.mubr.bf16.gmra.mxu0 %v4547_v58  ;;  %v1664_v9 = vpop.f32.mrf.mxu1  ;;  %1903 = vmatmul.mubr.bf16.gmra.mxu1 %v4547_v58 }
 0x148   : > { %v4266_v10 = vpack.c.bf16 %v2767_v6, %v2766_v63  ;;  %v4267_v11 = vpack.c.bf16 %v2769_v7, %v2768_v1  ;;  %1559 = vmatprep.mubr.bf16.mxu0 %v4728_v0  ;;  %1912 = vmatprep.mubr.bf16.mxu1 %v4728_v0  ;;  %v2770_v14 = vadd.f32 %v4983_v2, %v1311_v8 }
 0x149   : > { %v1313_v12 = vpop.f32.mrf.mxu0  ;;  %v1666_v13 = vpop.f32.mrf.mxu1  ;;  %v2772_v15 = vadd.f32 %v4985_v3, %v1664_v9 }
 0x14a   : > { %3780 = vst [vmem:[%s4998_s27 + $0x50] sm:$0xff] %v4266_v10  ;;  %3781 = vst [vmem:[%s4998_s27 + $0x58] sm:$0xff] %v4267_v11  ;;  %v2771_v16 = vadd.f32 %v4987_v4, %v1313_v12  ;;  %v2773_v17 = vadd.f32 %v4989_v5, %v1666_v13 }
 0x14b   : > { %v1315_v18 = vpop.f32.mrf.mxu0  ;;  %v1668_v19 = vpop.f32.mrf.mxu1 }
 0x14c   : > { %v4268_v21 = vpack.c.bf16 %v2771_v16, %v2770_v14  ;;  %v4269_v22 = vpack.c.bf16 %v2773_v17, %v2772_v15  ;;  %v2774_v25 = vadd.f32 %v4983_v2, %v1315_v18  ;;  %v2776_v26 = vadd.f32 %v4985_v3, %v1668_v19 }
 0x14d   : > { %v1317_v23 = vpop.f32.mrf.mxu0  ;;  %v1670_v24 = vpop.f32.mrf.mxu1 }
 0x14e   : > { %3782 = vst [vmem:[%s4998_s27 + $0x60] sm:$0xff] %v4268_v21  ;;  %3783 = vst [vmem:[%s4998_s27 + $0x68] sm:$0xff] %v4269_v22  ;;  %v2775_v27 = vadd.f32 %v4987_v4, %v1317_v23  ;;  %v2777_v28 = vadd.f32 %v4989_v5, %v1670_v24  ;;  %v4551_v24 = vld [vmem:[#allocation3 + $0xf8] sm:$0xff]  }
 0x14f   : > { %v1321_v29 = vpop.f32.mrf.mxu0  ;;  %1560 = vmatmul.mubr.bf16.gmra.mxu0 %v4548_v20  ;;  %v1674_v30 = vpop.f32.mrf.mxu1  ;;  %1913 = vmatmul.mubr.bf16.gmra.mxu1 %v4548_v20 }
 0x150   : > { %v4270_v31 = vpack.c.bf16 %v2775_v27, %v2774_v25  ;;  %v4271_v32 = vpack.c.bf16 %v2777_v28, %v2776_v26  ;;  %1569 = vmatprep.mubr.bf16.mxu0 %v4728_v0  ;;  %1922 = vmatprep.mubr.bf16.mxu1 %v4728_v0  ;;  %v2778_v35 = vadd.f32 %v4983_v2, %v1321_v29 }
 0x151   : > { %v1323_v33 = vpop.f32.mrf.mxu0  ;;  %v1676_v34 = vpop.f32.mrf.mxu1  ;;  %v2780_v36 = vadd.f32 %v4985_v3, %v1674_v30 }
 0x152   : > { %3784 = vst [vmem:[%s4998_s27 + $0x70] sm:$0xff] %v4270_v31  ;;  %3785 = vst [vmem:[%s4998_s27 + $0x78] sm:$0xff] %v4271_v32  ;;  %v2779_v37 = vadd.f32 %v4987_v4, %v1323_v33  ;;  %v2781_v38 = vadd.f32 %v4989_v5, %v1676_v34 }
 0x153   : > { %v1325_v39 = vpop.f32.mrf.mxu0  ;;  %v1678_v40 = vpop.f32.mrf.mxu1 }
 0x154   : > { %v4272_v42 = vpack.c.bf16 %v2779_v37, %v2778_v35  ;;  %v4273_v43 = vpack.c.bf16 %v2781_v38, %v2780_v36  ;;  %v2782_v46 = vadd.f32 %v4983_v2, %v1325_v39  ;;  %v2784_v47 = vadd.f32 %v4985_v3, %v1678_v40 }
 0x155   : > { %v1327_v44 = vpop.f32.mrf.mxu0  ;;  %v1680_v45 = vpop.f32.mrf.mxu1 }
 0x156   : > { %3786 = vst [vmem:[%s4998_s27 + $0x80] sm:$0xff] %v4272_v42  ;;  %3787 = vst [vmem:[%s4998_s27 + $0x88] sm:$0xff] %v4273_v43  ;;  %v2783_v48 = vadd.f32 %v4987_v4, %v1327_v44  ;;  %v2785_v49 = vadd.f32 %v4989_v5, %v1680_v45 }
 0x157   : > { %v1331_v50 = vpop.f32.mrf.mxu0  ;;  %1570 = vmatmul.mubr.bf16.gmra.mxu0 %v4549_v41  ;;  %v1684_v51 = vpop.f32.mrf.mxu1  ;;  %1923 = vmatmul.mubr.bf16.gmra.mxu1 %v4549_v41 }
 0x158   : > { %v4274_v52 = vpack.c.bf16 %v2783_v48, %v2782_v46  ;;  %v4275_v53 = vpack.c.bf16 %v2785_v49, %v2784_v47  ;;  %1579 = vmatprep.mubr.bf16.mxu0 %v4728_v0  ;;  %1932 = vmatprep.mubr.bf16.mxu1 %v4728_v0  ;;  %v2786_v56 = vadd.f32 %v4983_v2, %v1331_v50 }
 0x159   : > { %v1333_v54 = vpop.f32.mrf.mxu0  ;;  %v1686_v55 = vpop.f32.mrf.mxu1  ;;  %v2788_v57 = vadd.f32 %v4985_v3, %v1684_v51 }
 0x15a   : > { %3788 = vst [vmem:[%s4998_s27 + $0x90] sm:$0xff] %v4274_v52  ;;  %3789 = vst [vmem:[%s4998_s27 + $0x98] sm:$0xff] %v4275_v53  ;;  %v2787_v58 = vadd.f32 %v4987_v4, %v1333_v54  ;;  %v2789_v59 = vadd.f32 %v4989_v5, %v1686_v55 }
 0x15b   : > { %v1335_v60 = vpop.f32.mrf.mxu0  ;;  %v1688_v61 = vpop.f32.mrf.mxu1 }
 0x15c   : > { %v4276_v63 = vpack.c.bf16 %v2787_v58, %v2786_v56  ;;  %v4277_v1 = vpack.c.bf16 %v2789_v59, %v2788_v57  ;;  %v2790_v8 = vadd.f32 %v4983_v2, %v1335_v60  ;;  %v2792_v9 = vadd.f32 %v4985_v3, %v1688_v61 }
 0x15d   : > { %v1337_v6 = vpop.f32.mrf.mxu0  ;;  %v1690_v7 = vpop.f32.mrf.mxu1 }
 0x15e   : > { %3790 = vst [vmem:[%s4998_s27 + $0xa0] sm:$0xff] %v4276_v63  ;;  %3791 = vst [vmem:[%s4998_s27 + $0xa8] sm:$0xff] %v4277_v1  ;;  %v2791_v10 = vadd.f32 %v4987_v4, %v1337_v6  ;;  %v2793_v11 = vadd.f32 %v4989_v5, %v1690_v7 }
 0x15f   : > { %v1341_v12 = vpop.f32.mrf.mxu0  ;;  %1580 = vmatmul.mubr.bf16.gmra.mxu0 %v4550_v62  ;;  %v1694_v13 = vpop.f32.mrf.mxu1  ;;  %1933 = vmatmul.mubr.bf16.gmra.mxu1 %v4550_v62 }
 0x160   : > { %v4278_v14 = vpack.c.bf16 %v2791_v10, %v2790_v8  ;;  %v4279_v15 = vpack.c.bf16 %v2793_v11, %v2792_v9  ;;  %1589 = vmatprep.mubr.bf16.mxu0 %v4728_v0  ;;  %1942 = vmatprep.mubr.bf16.mxu1 %v4728_v0  ;;  %v2794_v18 = vadd.f32 %v4983_v2, %v1341_v12 }
 0x161   : > { %v1343_v16 = vpop.f32.mrf.mxu0  ;;  %v1696_v17 = vpop.f32.mrf.mxu1  ;;  %v2796_v19 = vadd.f32 %v4985_v3, %v1694_v13 }
 0x162   : > { %3792 = vst [vmem:[%s4998_s27 + $0xb0] sm:$0xff] %v4278_v14  ;;  %3793 = vst [vmem:[%s4998_s27 + $0xb8] sm:$0xff] %v4279_v15  ;;  %v2795_v20 = vadd.f32 %v4987_v4, %v1343_v16  ;;  %v2797_v21 = vadd.f32 %v4989_v5, %v1696_v17 }
 0x163   : > { %v1345_v22 = vpop.f32.mrf.mxu0  ;;  %v1698_v23 = vpop.f32.mrf.mxu1 }
 0x164   : > { %v4280_v25 = vpack.c.bf16 %v2795_v20, %v2794_v18  ;;  %v4281_v26 = vpack.c.bf16 %v2797_v21, %v2796_v19  ;;  %v2798_v0 = vadd.f32 %v4983_v2, %v1345_v22  ;;  %v2800_v29 = vadd.f32 %v4985_v3, %v1698_v23 }
 0x165   : > { %v1347_v27 = vpop.f32.mrf.mxu0  ;;  %v1700_v28 = vpop.f32.mrf.mxu1 }
 0x166   : > { %3794 = vst [vmem:[%s4998_s27 + $0xc0] sm:$0xff] %v4280_v25  ;;  %3795 = vst [vmem:[%s4998_s27 + $0xc8] sm:$0xff] %v4281_v26  ;;  %v2799_v30 = vadd.f32 %v4987_v4, %v1347_v27  ;;  %v2801_v31 = vadd.f32 %v4989_v5, %v1700_v28 }
 0x167   : > { %v1351_v32 = vpop.f32.mrf.mxu0  ;;  %1590 = vmatmul.mubr.bf16.gmra.mxu0 %v4551_v24  ;;  %v1704_v33 = vpop.f32.mrf.mxu1  ;;  %1943 = vmatmul.mubr.bf16.gmra.mxu1 %v4551_v24 }
 0x168   : > { %v4282_v34 = vpack.c.bf16 %v2799_v30, %v2798_v0  ;;  %v4283_v35 = vpack.c.bf16 %v2801_v31, %v2800_v29  ;;  %v2802_v38 = vadd.f32 %v4983_v2, %v1351_v32  ;;  %v2804_v39 = vadd.f32 %v4985_v3, %v1704_v33 }
 0x169   : > { %v1353_v36 = vpop.f32.mrf.mxu0  ;;  %v1706_v37 = vpop.f32.mrf.mxu1 }
 0x16a   : > { %3796 = vst [vmem:[%s4998_s27 + $0xd0] sm:$0xff] %v4282_v34  ;;  %3797 = vst [vmem:[%s4998_s27 + $0xd8] sm:$0xff] %v4283_v35  ;;  %v2803_v40 = vadd.f32 %v4987_v4, %v1353_v36  ;;  %v2805_v41 = vadd.f32 %v4989_v5, %v1706_v37 }
 0x16b   : > { %v1355_v42 = vpop.f32.mrf.mxu0  ;;  %v1708_v43 = vpop.f32.mrf.mxu1 }
 0x16c   : > { %v4284_v44 = vpack.c.bf16 %v2803_v40, %v2802_v38  ;;  %v4285_v45 = vpack.c.bf16 %v2805_v41, %v2804_v39  ;;  %v2806_v48 = vadd.f32 %v4983_v2, %v1355_v42  ;;  %v2808_v49 = vadd.f32 %v4985_v3, %v1708_v43 }
 0x16d   : > { %v1357_v46 = vpop.f32.mrf.mxu0  ;;  %v1710_v47 = vpop.f32.mrf.mxu1 }
 0x16e   : > { %3798 = vst [vmem:[%s4998_s27 + $0xe0] sm:$0xff] %v4284_v44  ;;  %3799 = vst [vmem:[%s4998_s27 + $0xe8] sm:$0xff] %v4285_v45  ;;  %v2807_v50 = vadd.f32 %v4987_v4, %v1357_v46  ;;  %v2809_v51 = vadd.f32 %v4989_v5, %v1710_v47 }
 0x16f   : > { %v1361_v52 = vpop.f32.mrf.mxu0  ;;  %v1714_v53 = vpop.f32.mrf.mxu1 }
 0x170   : > { %v4286_v54 = vpack.c.bf16 %v2807_v50, %v2806_v48  ;;  %v4287_v55 = vpack.c.bf16 %v2809_v51, %v2808_v49  ;;  %v2810_v58 = vadd.f32 %v4983_v2, %v1361_v52  ;;  %v2812_v59 = vadd.f32 %v4985_v3, %v1714_v53 }
 0x171   : > { %v1363_v56 = vpop.f32.mrf.mxu0  ;;  %v1716_v57 = vpop.f32.mrf.mxu1 }
 0x172   : > { %3800 = vst [vmem:[%s4998_s27 + $0xf0] sm:$0xff] %v4286_v54  ;;  %3801 = vst [vmem:[%s4998_s27 + $0xf8] sm:$0xff] %v4287_v55  ;;  %v2811_v60 = vadd.f32 %v4987_v4, %v1363_v56  ;;  %v2813_v61 = vadd.f32 %v4989_v5, %v1716_v57 }
 0x173   : > { %v1365_v62 = vpop.f32.mrf.mxu0  ;;  %v1718_v63 = vpop.f32.mrf.mxu1 }
 0x174   : > { %v4288_v1 = vpack.c.bf16 %v2811_v60, %v2810_v58  ;;  %v4289_v6 = vpack.c.bf16 %v2813_v61, %v2812_v59  ;;  %v2814_v9 = vadd.f32 %v4983_v2, %v1365_v62  ;;  %v2816_v10 = vadd.f32 %v4985_v3, %v1718_v63 }
 0x175   : > { %v1367_v7 = vpop.f32.mrf.mxu0  ;;  %v1720_v8 = vpop.f32.mrf.mxu1 }
 0x176   : > { %3802 = vst [vmem:[%s4998_s27 + $0x100] sm:$0xff] %v4288_v1  ;;  %3803 = vst [vmem:[%s4998_s27 + $0x108] sm:$0xff] %v4289_v6  ;;  %v2815_v11 = vadd.f32 %v4987_v4, %v1367_v7  ;;  %v2817_v12 = vadd.f32 %v4989_v5, %v1720_v8 }
 0x177   : > { %v1371_v13 = vpop.f32.mrf.mxu0  ;;  %v1724_v14 = vpop.f32.mrf.mxu1 }
 0x178   : > { %v4290_v15 = vpack.c.bf16 %v2815_v11, %v2814_v9  ;;  %v4291_v16 = vpack.c.bf16 %v2817_v12, %v2816_v10  ;;  %v2818_v19 = vadd.f32 %v4983_v2, %v1371_v13  ;;  %v2820_v20 = vadd.f32 %v4985_v3, %v1724_v14 }
 0x179   : > { %v1373_v17 = vpop.f32.mrf.mxu0  ;;  %v1726_v18 = vpop.f32.mrf.mxu1 }
 0x17a   : > { %3804 = vst [vmem:[%s4998_s27 + $0x110] sm:$0xff] %v4290_v15  ;;  %3805 = vst [vmem:[%s4998_s27 + $0x118] sm:$0xff] %v4291_v16  ;;  %v2819_v21 = vadd.f32 %v4987_v4, %v1373_v17  ;;  %v2821_v22 = vadd.f32 %v4989_v5, %v1726_v18 }
 0x17b   : > { %v1375_v23 = vpop.f32.mrf.mxu0  ;;  %v1728_v24 = vpop.f32.mrf.mxu1 }
 0x17c   : > { %v4292_v25 = vpack.c.bf16 %v2819_v21, %v2818_v19  ;;  %v4293_v26 = vpack.c.bf16 %v2821_v22, %v2820_v20  ;;  %v2822_v0 = vadd.f32 %v4983_v2, %v1375_v23  ;;  %v2824_v29 = vadd.f32 %v4985_v3, %v1728_v24 }
 0x17d   : > { %v1377_v27 = vpop.f32.mrf.mxu0  ;;  %v1730_v28 = vpop.f32.mrf.mxu1 }
 0x17e   : > { %3806 = vst [vmem:[%s4998_s27 + $0x120] sm:$0xff] %v4292_v25  ;;  %3807 = vst [vmem:[%s4998_s27 + $0x128] sm:$0xff] %v4293_v26  ;;  %v2823_v30 = vadd.f32 %v4987_v4, %v1377_v27  ;;  %v2825_v31 = vadd.f32 %v4989_v5, %v1730_v28 }
 0x17f   : > { %v1381_v32 = vpop.f32.mrf.mxu0  ;;  %v1734_v33 = vpop.f32.mrf.mxu1 }
 0x180   : > { %v4294_v34 = vpack.c.bf16 %v2823_v30, %v2822_v0  ;;  %v4295_v35 = vpack.c.bf16 %v2825_v31, %v2824_v29  ;;  %v2826_v38 = vadd.f32 %v4983_v2, %v1381_v32  ;;  %v2828_v39 = vadd.f32 %v4985_v3, %v1734_v33 }
 0x181   : > { %v1383_v36 = vpop.f32.mrf.mxu0  ;;  %v1736_v37 = vpop.f32.mrf.mxu1 }
 0x182   : > { %3808 = vst [vmem:[%s4998_s27 + $0x130] sm:$0xff] %v4294_v34  ;;  %3809 = vst [vmem:[%s4998_s27 + $0x138] sm:$0xff] %v4295_v35  ;;  %v2827_v40 = vadd.f32 %v4987_v4, %v1383_v36  ;;  %v2829_v41 = vadd.f32 %v4989_v5, %v1736_v37 }
 0x183   : > { %v1385_v42 = vpop.f32.mrf.mxu0  ;;  %v1738_v43 = vpop.f32.mrf.mxu1 }
 0x184   : > { %v4296_v44 = vpack.c.bf16 %v2827_v40, %v2826_v38  ;;  %v4297_v45 = vpack.c.bf16 %v2829_v41, %v2828_v39  ;;  %v2830_v48 = vadd.f32 %v4983_v2, %v1385_v42  ;;  %v2832_v49 = vadd.f32 %v4985_v3, %v1738_v43 }
 0x185   : > { %v1387_v46 = vpop.f32.mrf.mxu0  ;;  %v1740_v47 = vpop.f32.mrf.mxu1 }
 0x186   : > { %3810 = vst [vmem:[%s4998_s27 + $0x140] sm:$0xff] %v4296_v44  ;;  %3811 = vst [vmem:[%s4998_s27 + $0x148] sm:$0xff] %v4297_v45  ;;  %v2831_v50 = vadd.f32 %v4987_v4, %v1387_v46  ;;  %v2833_v51 = vadd.f32 %v4989_v5, %v1740_v47 }
 0x187   : > { %v1391_v52 = vpop.f32.mrf.mxu0  ;;  %v1744_v53 = vpop.f32.mrf.mxu1 }
 0x188   : > { %v4298_v54 = vpack.c.bf16 %v2831_v50, %v2830_v48  ;;  %v4299_v55 = vpack.c.bf16 %v2833_v51, %v2832_v49  ;;  %v2834_v58 = vadd.f32 %v4983_v2, %v1391_v52  ;;  %v2836_v59 = vadd.f32 %v4985_v3, %v1744_v53 }
 0x189   : > { %v1393_v56 = vpop.f32.mrf.mxu0  ;;  %v1746_v57 = vpop.f32.mrf.mxu1 }
 0x18a   : > { %3812 = vst [vmem:[%s4998_s27 + $0x150] sm:$0xff] %v4298_v54  ;;  %3813 = vst [vmem:[%s4998_s27 + $0x158] sm:$0xff] %v4299_v55  ;;  %v2835_v60 = vadd.f32 %v4987_v4, %v1393_v56  ;;  %v2837_v61 = vadd.f32 %v4989_v5, %v1746_v57 }
 0x18b   : > { %v1395_v62 = vpop.f32.mrf.mxu0  ;;  %v1748_v63 = vpop.f32.mrf.mxu1 }
 0x18c   : > { %v4300_v1 = vpack.c.bf16 %v2835_v60, %v2834_v58  ;;  %v4301_v6 = vpack.c.bf16 %v2837_v61, %v2836_v59  ;;  %v2838_v9 = vadd.f32 %v4983_v2, %v1395_v62  ;;  %v2840_v10 = vadd.f32 %v4985_v3, %v1748_v63 }
 0x18d   : > { %v1397_v7 = vpop.f32.mrf.mxu0  ;;  %v1750_v8 = vpop.f32.mrf.mxu1 }
 0x18e   : > { %3814 = vst [vmem:[%s4998_s27 + $0x160] sm:$0xff] %v4300_v1  ;;  %3815 = vst [vmem:[%s4998_s27 + $0x168] sm:$0xff] %v4301_v6  ;;  %v2839_v11 = vadd.f32 %v4987_v4, %v1397_v7  ;;  %v2841_v12 = vadd.f32 %v4989_v5, %v1750_v8 }
 0x18f   : > { %v1401_v13 = vpop.f32.mrf.mxu0  ;;  %v1754_v14 = vpop.f32.mrf.mxu1 }
 0x190   : > { %v4302_v15 = vpack.c.bf16 %v2839_v11, %v2838_v9  ;;  %v4303_v16 = vpack.c.bf16 %v2841_v12, %v2840_v10  ;;  %v2842_v19 = vadd.f32 %v4983_v2, %v1401_v13  ;;  %v2844_v20 = vadd.f32 %v4985_v3, %v1754_v14 }
 0x191   : > { %v1403_v17 = vpop.f32.mrf.mxu0  ;;  %v1756_v18 = vpop.f32.mrf.mxu1 }
 0x192   : > { %3816 = vst [vmem:[%s4998_s27 + $0x170] sm:$0xff] %v4302_v15  ;;  %3817 = vst [vmem:[%s4998_s27 + $0x178] sm:$0xff] %v4303_v16  ;;  %v2843_v21 = vadd.f32 %v4987_v4, %v1403_v17  ;;  %v2845_v22 = vadd.f32 %v4989_v5, %v1756_v18 }
 0x193   : > { %v1405_v23 = vpop.f32.mrf.mxu0  ;;  %v1758_v24 = vpop.f32.mrf.mxu1 }
 0x194   : > { %v4304_v25 = vpack.c.bf16 %v2843_v21, %v2842_v19  ;;  %v4305_v26 = vpack.c.bf16 %v2845_v22, %v2844_v20  ;;  %v2846_v0 = vadd.f32 %v4983_v2, %v1405_v23  ;;  %v2848_v29 = vadd.f32 %v4985_v3, %v1758_v24 }
 0x195   : > { %v1407_v27 = vpop.f32.mrf.mxu0  ;;  %v1760_v28 = vpop.f32.mrf.mxu1 }
 0x196   : > { %3818 = vst [vmem:[%s4998_s27 + $0x180] sm:$0xff] %v4304_v25  ;;  %3819 = vst [vmem:[%s4998_s27 + $0x188] sm:$0xff] %v4305_v26  ;;  %v2847_v30 = vadd.f32 %v4987_v4, %v1407_v27  ;;  %v2849_v31 = vadd.f32 %v4989_v5, %v1760_v28 }
 0x197   : > { %v1411_v32 = vpop.f32.mrf.mxu0  ;;  %v1764_v33 = vpop.f32.mrf.mxu1 }
 0x198   : > { %v4306_v34 = vpack.c.bf16 %v2847_v30, %v2846_v0  ;;  %v4307_v35 = vpack.c.bf16 %v2849_v31, %v2848_v29  ;;  %v2850_v38 = vadd.f32 %v4983_v2, %v1411_v32  ;;  %v2852_v39 = vadd.f32 %v4985_v3, %v1764_v33 }
 0x199   : > { %v1413_v36 = vpop.f32.mrf.mxu0  ;;  %v1766_v37 = vpop.f32.mrf.mxu1 }
 0x19a   : > { %3820 = vst [vmem:[%s4998_s27 + $0x190] sm:$0xff] %v4306_v34  ;;  %3821 = vst [vmem:[%s4998_s27 + $0x198] sm:$0xff] %v4307_v35  ;;  %v2851_v40 = vadd.f32 %v4987_v4, %v1413_v36  ;;  %v2853_v41 = vadd.f32 %v4989_v5, %v1766_v37 }
 0x19b   : > { %v1415_v42 = vpop.f32.mrf.mxu0  ;;  %v1768_v43 = vpop.f32.mrf.mxu1 }
 0x19c   : > { %v4308_v44 = vpack.c.bf16 %v2851_v40, %v2850_v38  ;;  %v4309_v45 = vpack.c.bf16 %v2853_v41, %v2852_v39  ;;  %v2854_v48 = vadd.f32 %v4983_v2, %v1415_v42  ;;  %v2856_v49 = vadd.f32 %v4985_v3, %v1768_v43 }
 0x19d   : > { %v1417_v46 = vpop.f32.mrf.mxu0  ;;  %v1770_v47 = vpop.f32.mrf.mxu1 }
 0x19e   : > { %3822 = vst [vmem:[%s4998_s27 + $0x1a0] sm:$0xff] %v4308_v44  ;;  %3823 = vst [vmem:[%s4998_s27 + $0x1a8] sm:$0xff] %v4309_v45  ;;  %v2855_v50 = vadd.f32 %v4987_v4, %v1417_v46  ;;  %v2857_v51 = vadd.f32 %v4989_v5, %v1770_v47 }
 0x19f   : > { %v1421_v52 = vpop.f32.mrf.mxu0  ;;  %v1774_v53 = vpop.f32.mrf.mxu1 }
 0x1a0   : > { %v4310_v54 = vpack.c.bf16 %v2855_v50, %v2854_v48  ;;  %v4311_v55 = vpack.c.bf16 %v2857_v51, %v2856_v49  ;;  %v2858_v58 = vadd.f32 %v4983_v2, %v1421_v52  ;;  %v2860_v59 = vadd.f32 %v4985_v3, %v1774_v53 }
 0x1a1   : > { %v1423_v56 = vpop.f32.mrf.mxu0  ;;  %v1776_v57 = vpop.f32.mrf.mxu1 }
 0x1a2   : > { %3824 = vst [vmem:[%s4998_s27 + $0x1b0] sm:$0xff] %v4310_v54  ;;  %3825 = vst [vmem:[%s4998_s27 + $0x1b8] sm:$0xff] %v4311_v55  ;;  %v2859_v60 = vadd.f32 %v4987_v4, %v1423_v56  ;;  %v2861_v61 = vadd.f32 %v4989_v5, %v1776_v57 }
 0x1a3   : > { %v1425_v62 = vpop.f32.mrf.mxu0  ;;  %v1778_v63 = vpop.f32.mrf.mxu1 }
 0x1a4   : > { %v4312_v1 = vpack.c.bf16 %v2859_v60, %v2858_v58  ;;  %v4313_v6 = vpack.c.bf16 %v2861_v61, %v2860_v59  ;;  %v2862_v9 = vadd.f32 %v4983_v2, %v1425_v62  ;;  %v2864_v10 = vadd.f32 %v4985_v3, %v1778_v63 }
 0x1a5   : > { %v1427_v7 = vpop.f32.mrf.mxu0  ;;  %v1780_v8 = vpop.f32.mrf.mxu1 }
 0x1a6   : > { %3826 = vst [vmem:[%s4998_s27 + $0x1c0] sm:$0xff] %v4312_v1  ;;  %3827 = vst [vmem:[%s4998_s27 + $0x1c8] sm:$0xff] %v4313_v6  ;;  %v2863_v11 = vadd.f32 %v4987_v4, %v1427_v7  ;;  %v2865_v12 = vadd.f32 %v4989_v5, %v1780_v8 }
 0x1a7   : > { %v1431_v13 = vpop.f32.mrf.mxu0  ;;  %v1784_v14 = vpop.f32.mrf.mxu1 }
 0x1a8   : > { %v4314_v15 = vpack.c.bf16 %v2863_v11, %v2862_v9  ;;  %v4315_v16 = vpack.c.bf16 %v2865_v12, %v2864_v10  ;;  %v2866_v19 = vadd.f32 %v4983_v2, %v1431_v13  ;;  %v2868_v20 = vadd.f32 %v4985_v3, %v1784_v14 }
 0x1a9   : > { %v1433_v17 = vpop.f32.mrf.mxu0  ;;  %v1786_v18 = vpop.f32.mrf.mxu1 }
 0x1aa   : > { %3828 = vst [vmem:[%s4998_s27 + $0x1d0] sm:$0xff] %v4314_v15  ;;  %3829 = vst [vmem:[%s4998_s27 + $0x1d8] sm:$0xff] %v4315_v16  ;;  %v2867_v21 = vadd.f32 %v4987_v4, %v1433_v17  ;;  %v2869_v22 = vadd.f32 %v4989_v5, %v1786_v18 }
 0x1ab   : > { %v1435_v23 = vpop.f32.mrf.mxu0  ;;  %v1788_v24 = vpop.f32.mrf.mxu1 }
 0x1ac   : > { %v4316_v25 = vpack.c.bf16 %v2867_v21, %v2866_v19  ;;  %v4317_v26 = vpack.c.bf16 %v2869_v22, %v2868_v20  ;;  %v2870_v0 = vadd.f32 %v4983_v2, %v1435_v23  ;;  %v2872_v29 = vadd.f32 %v4985_v3, %v1788_v24 }
 0x1ad   : > { %v1437_v27 = vpop.f32.mrf.mxu0  ;;  %v1790_v28 = vpop.f32.mrf.mxu1 }
 0x1ae   : > { %3830 = vst [vmem:[%s4998_s27 + $0x1e0] sm:$0xff] %v4316_v25  ;;  %3831 = vst [vmem:[%s4998_s27 + $0x1e8] sm:$0xff] %v4317_v26  ;;  %v2871_v30 = vadd.f32 %v4987_v4, %v1437_v27  ;;  %v2873_v31 = vadd.f32 %v4989_v5, %v1790_v28 }
 0x1af   : > { %v1441_v32 = vpop.f32.mrf.mxu0  ;;  %v1794_v33 = vpop.f32.mrf.mxu1 }
 0x1b0   : > { %v4318_v34 = vpack.c.bf16 %v2871_v30, %v2870_v0  ;;  %v4319_v35 = vpack.c.bf16 %v2873_v31, %v2872_v29  ;;  %v2874_v38 = vadd.f32 %v4983_v2, %v1441_v32  ;;  %v2876_v39 = vadd.f32 %v4985_v3, %v1794_v33 }
 0x1b1   : > { %v1443_v36 = vpop.f32.mrf.mxu0  ;;  %v1796_v37 = vpop.f32.mrf.mxu1 }
 0x1b2   : > { %3832 = vst [vmem:[%s4998_s27 + $0x1f0] sm:$0xff] %v4318_v34  ;;  %3833 = vst [vmem:[%s4998_s27 + $0x1f8] sm:$0xff] %v4319_v35  ;;  %v2875_v40 = vadd.f32 %v4987_v4, %v1443_v36  ;;  %v2877_v41 = vadd.f32 %v4989_v5, %v1796_v37 }
 0x1b3   : > { %v1445_v42 = vpop.f32.mrf.mxu0  ;;  %v1798_v43 = vpop.f32.mrf.mxu1 }
 0x1b4   : > { %v4320_v44 = vpack.c.bf16 %v2875_v40, %v2874_v38  ;;  %v4321_v45 = vpack.c.bf16 %v2877_v41, %v2876_v39  ;;  %v2878_v48 = vadd.f32 %v4983_v2, %v1445_v42  ;;  %v2880_v49 = vadd.f32 %v4985_v3, %v1798_v43 }
 0x1b5   : > { %v1447_v46 = vpop.f32.mrf.mxu0  ;;  %v1800_v47 = vpop.f32.mrf.mxu1 }
 0x1b6   : > { %3834 = vst [vmem:[%s4998_s27 + $0x200] sm:$0xff] %v4320_v44  ;;  %3835 = vst [vmem:[%s4998_s27 + $0x208] sm:$0xff] %v4321_v45  ;;  %v2879_v50 = vadd.f32 %v4987_v4, %v1447_v46  ;;  %v2881_v51 = vadd.f32 %v4989_v5, %v1800_v47 }
 0x1b7   : > { %v1451_v52 = vpop.f32.mrf.mxu0  ;;  %v1804_v53 = vpop.f32.mrf.mxu1 }
 0x1b8   : > { %v4322_v54 = vpack.c.bf16 %v2879_v50, %v2878_v48  ;;  %v4323_v55 = vpack.c.bf16 %v2881_v51, %v2880_v49  ;;  %v2882_v58 = vadd.f32 %v4983_v2, %v1451_v52  ;;  %v2884_v59 = vadd.f32 %v4985_v3, %v1804_v53 }
 0x1b9   : > { %v1453_v56 = vpop.f32.mrf.mxu0  ;;  %v1806_v57 = vpop.f32.mrf.mxu1 }
 0x1ba   : > { %3836 = vst [vmem:[%s4998_s27 + $0x210] sm:$0xff] %v4322_v54  ;;  %3837 = vst [vmem:[%s4998_s27 + $0x218] sm:$0xff] %v4323_v55  ;;  %v2883_v60 = vadd.f32 %v4987_v4, %v1453_v56  ;;  %v2885_v61 = vadd.f32 %v4989_v5, %v1806_v57 }
 0x1bb   : > { %v1455_v62 = vpop.f32.mrf.mxu0  ;;  %v1808_v63 = vpop.f32.mrf.mxu1 }
 0x1bc   : > { %v4324_v1 = vpack.c.bf16 %v2883_v60, %v2882_v58  ;;  %v4325_v6 = vpack.c.bf16 %v2885_v61, %v2884_v59  ;;  %v2886_v9 = vadd.f32 %v4983_v2, %v1455_v62  ;;  %v2888_v10 = vadd.f32 %v4985_v3, %v1808_v63 }
 0x1bd   : > { %v1457_v7 = vpop.f32.mrf.mxu0  ;;  %v1810_v8 = vpop.f32.mrf.mxu1 }
 0x1be   : > { %3838 = vst [vmem:[%s4998_s27 + $0x220] sm:$0xff] %v4324_v1  ;;  %3839 = vst [vmem:[%s4998_s27 + $0x228] sm:$0xff] %v4325_v6  ;;  %v2887_v11 = vadd.f32 %v4987_v4, %v1457_v7  ;;  %v2889_v12 = vadd.f32 %v4989_v5, %v1810_v8 }
 0x1bf   : > { %v1461_v13 = vpop.f32.mrf.mxu0  ;;  %v1814_v14 = vpop.f32.mrf.mxu1 }
 0x1c0   : > { %v4326_v15 = vpack.c.bf16 %v2887_v11, %v2886_v9  ;;  %v4327_v16 = vpack.c.bf16 %v2889_v12, %v2888_v10  ;;  %v2890_v19 = vadd.f32 %v4983_v2, %v1461_v13  ;;  %v2892_v20 = vadd.f32 %v4985_v3, %v1814_v14 }
 0x1c1   : > { %v1463_v17 = vpop.f32.mrf.mxu0  ;;  %v1816_v18 = vpop.f32.mrf.mxu1 }
 0x1c2   : > { %3840 = vst [vmem:[%s4998_s27 + $0x230] sm:$0xff] %v4326_v15  ;;  %3841 = vst [vmem:[%s4998_s27 + $0x238] sm:$0xff] %v4327_v16  ;;  %v2891_v21 = vadd.f32 %v4987_v4, %v1463_v17  ;;  %v2893_v22 = vadd.f32 %v4989_v5, %v1816_v18 }
 0x1c3   : > { %v1465_v23 = vpop.f32.mrf.mxu0  ;;  %v1818_v24 = vpop.f32.mrf.mxu1 }
 0x1c4   : > { %v4328_v25 = vpack.c.bf16 %v2891_v21, %v2890_v19  ;;  %v4329_v26 = vpack.c.bf16 %v2893_v22, %v2892_v20  ;;  %v2894_v0 = vadd.f32 %v4983_v2, %v1465_v23  ;;  %v2896_v29 = vadd.f32 %v4985_v3, %v1818_v24 }
 0x1c5   : > { %v1467_v27 = vpop.f32.mrf.mxu0  ;;  %v1820_v28 = vpop.f32.mrf.mxu1 }
 0x1c6   : > { %3842 = vst [vmem:[%s4998_s27 + $0x240] sm:$0xff] %v4328_v25  ;;  %3843 = vst [vmem:[%s4998_s27 + $0x248] sm:$0xff] %v4329_v26  ;;  %v2895_v30 = vadd.f32 %v4987_v4, %v1467_v27  ;;  %v2897_v31 = vadd.f32 %v4989_v5, %v1820_v28 }
 0x1c7   : > { %v1471_v32 = vpop.f32.mrf.mxu0  ;;  %v1824_v33 = vpop.f32.mrf.mxu1 }
 0x1c8   : > { %v4330_v34 = vpack.c.bf16 %v2895_v30, %v2894_v0  ;;  %v4331_v35 = vpack.c.bf16 %v2897_v31, %v2896_v29  ;;  %v2898_v38 = vadd.f32 %v4983_v2, %v1471_v32  ;;  %v2900_v39 = vadd.f32 %v4985_v3, %v1824_v33 }
 0x1c9   : > { %v1473_v36 = vpop.f32.mrf.mxu0  ;;  %v1826_v37 = vpop.f32.mrf.mxu1 }
 0x1ca   : > { %3844 = vst [vmem:[%s4998_s27 + $0x250] sm:$0xff] %v4330_v34  ;;  %3845 = vst [vmem:[%s4998_s27 + $0x258] sm:$0xff] %v4331_v35  ;;  %v2899_v40 = vadd.f32 %v4987_v4, %v1473_v36  ;;  %v2901_v41 = vadd.f32 %v4989_v5, %v1826_v37 }
 0x1cb   : > { %v1475_v42 = vpop.f32.mrf.mxu0  ;;  %v1828_v43 = vpop.f32.mrf.mxu1 }
 0x1cc   : > { %v4332_v44 = vpack.c.bf16 %v2899_v40, %v2898_v38  ;;  %v4333_v45 = vpack.c.bf16 %v2901_v41, %v2900_v39  ;;  %v2902_v48 = vadd.f32 %v4983_v2, %v1475_v42  ;;  %v2904_v49 = vadd.f32 %v4985_v3, %v1828_v43 }
 0x1cd   : > { %v1477_v46 = vpop.f32.mrf.mxu0  ;;  %v1830_v47 = vpop.f32.mrf.mxu1 }
 0x1ce   : > { %3846 = vst [vmem:[%s4998_s27 + $0x260] sm:$0xff] %v4332_v44  ;;  %3847 = vst [vmem:[%s4998_s27 + $0x268] sm:$0xff] %v4333_v45  ;;  %v2903_v50 = vadd.f32 %v4987_v4, %v1477_v46  ;;  %v2905_v51 = vadd.f32 %v4989_v5, %v1830_v47 }
 0x1cf   : > { %v1481_v52 = vpop.f32.mrf.mxu0  ;;  %v1834_v53 = vpop.f32.mrf.mxu1 }
 0x1d0   : > { %v4334_v54 = vpack.c.bf16 %v2903_v50, %v2902_v48  ;;  %v4335_v55 = vpack.c.bf16 %v2905_v51, %v2904_v49  ;;  %v2906_v58 = vadd.f32 %v4983_v2, %v1481_v52  ;;  %v2908_v59 = vadd.f32 %v4985_v3, %v1834_v53 }
 0x1d1   : > { %v1483_v56 = vpop.f32.mrf.mxu0  ;;  %v1836_v57 = vpop.f32.mrf.mxu1 }
 0x1d2   : > { %3848 = vst [vmem:[%s4998_s27 + $0x270] sm:$0xff] %v4334_v54  ;;  %3849 = vst [vmem:[%s4998_s27 + $0x278] sm:$0xff] %v4335_v55  ;;  %v2907_v60 = vadd.f32 %v4987_v4, %v1483_v56  ;;  %v2909_v61 = vadd.f32 %v4989_v5, %v1836_v57 }
 0x1d3   : > { %v1485_v62 = vpop.f32.mrf.mxu0  ;;  %v1838_v63 = vpop.f32.mrf.mxu1 }
 0x1d4   : > { %v4336_v1 = vpack.c.bf16 %v2907_v60, %v2906_v58  ;;  %v4337_v6 = vpack.c.bf16 %v2909_v61, %v2908_v59  ;;  %v2910_v9 = vadd.f32 %v4983_v2, %v1485_v62  ;;  %v2912_v10 = vadd.f32 %v4985_v3, %v1838_v63 }
 0x1d5   : > { %v1487_v7 = vpop.f32.mrf.mxu0  ;;  %v1840_v8 = vpop.f32.mrf.mxu1 }
 0x1d6   : > { %3850 = vst [vmem:[%s4998_s27 + $0x280] sm:$0xff] %v4336_v1  ;;  %3851 = vst [vmem:[%s4998_s27 + $0x288] sm:$0xff] %v4337_v6  ;;  %v2911_v11 = vadd.f32 %v4987_v4, %v1487_v7  ;;  %v2913_v12 = vadd.f32 %v4989_v5, %v1840_v8 }
 0x1d7   : > { %v1491_v13 = vpop.f32.mrf.mxu0  ;;  %v1844_v14 = vpop.f32.mrf.mxu1 }
 0x1d8   : > { %v4338_v15 = vpack.c.bf16 %v2911_v11, %v2910_v9  ;;  %v4339_v16 = vpack.c.bf16 %v2913_v12, %v2912_v10  ;;  %v2914_v19 = vadd.f32 %v4983_v2, %v1491_v13  ;;  %v2916_v20 = vadd.f32 %v4985_v3, %v1844_v14 }
 0x1d9   : > { %v1493_v17 = vpop.f32.mrf.mxu0  ;;  %v1846_v18 = vpop.f32.mrf.mxu1 }
 0x1da   : > { %3852 = vst [vmem:[%s4998_s27 + $0x290] sm:$0xff] %v4338_v15  ;;  %3853 = vst [vmem:[%s4998_s27 + $0x298] sm:$0xff] %v4339_v16  ;;  %v2915_v21 = vadd.f32 %v4987_v4, %v1493_v17  ;;  %v2917_v22 = vadd.f32 %v4989_v5, %v1846_v18 }
 0x1db   : > { %v1495_v23 = vpop.f32.mrf.mxu0  ;;  %v1848_v24 = vpop.f32.mrf.mxu1 }
 0x1dc   : > { %v4340_v25 = vpack.c.bf16 %v2915_v21, %v2914_v19  ;;  %v4341_v26 = vpack.c.bf16 %v2917_v22, %v2916_v20  ;;  %v2918_v0 = vadd.f32 %v4983_v2, %v1495_v23  ;;  %v2920_v29 = vadd.f32 %v4985_v3, %v1848_v24 }
 0x1dd   : > { %v1497_v27 = vpop.f32.mrf.mxu0  ;;  %v1850_v28 = vpop.f32.mrf.mxu1 }
 0x1de   : > { %3854 = vst [vmem:[%s4998_s27 + $0x2a0] sm:$0xff] %v4340_v25  ;;  %3855 = vst [vmem:[%s4998_s27 + $0x2a8] sm:$0xff] %v4341_v26  ;;  %v2919_v30 = vadd.f32 %v4987_v4, %v1497_v27  ;;  %v2921_v31 = vadd.f32 %v4989_v5, %v1850_v28 }
 0x1df   : > { %v1501_v32 = vpop.f32.mrf.mxu0  ;;  %v1854_v33 = vpop.f32.mrf.mxu1 }
 0x1e0   : > { %v4342_v34 = vpack.c.bf16 %v2919_v30, %v2918_v0  ;;  %v4343_v35 = vpack.c.bf16 %v2921_v31, %v2920_v29  ;;  %v2922_v38 = vadd.f32 %v4983_v2, %v1501_v32  ;;  %v2924_v39 = vadd.f32 %v4985_v3, %v1854_v33 }
 0x1e1   : > { %v1503_v36 = vpop.f32.mrf.mxu0  ;;  %v1856_v37 = vpop.f32.mrf.mxu1 }
 0x1e2   : > { %3856 = vst [vmem:[%s4998_s27 + $0x2b0] sm:$0xff] %v4342_v34  ;;  %3857 = vst [vmem:[%s4998_s27 + $0x2b8] sm:$0xff] %v4343_v35  ;;  %v2923_v40 = vadd.f32 %v4987_v4, %v1503_v36  ;;  %v2925_v41 = vadd.f32 %v4989_v5, %v1856_v37 }
 0x1e3   : > { %v1505_v42 = vpop.f32.mrf.mxu0  ;;  %v1858_v43 = vpop.f32.mrf.mxu1 }
 0x1e4   : > { %v4344_v44 = vpack.c.bf16 %v2923_v40, %v2922_v38  ;;  %v4345_v45 = vpack.c.bf16 %v2925_v41, %v2924_v39  ;;  %v2926_v48 = vadd.f32 %v4983_v2, %v1505_v42  ;;  %v2928_v49 = vadd.f32 %v4985_v3, %v1858_v43 }
 0x1e5   : > { %v1507_v46 = vpop.f32.mrf.mxu0  ;;  %v1860_v47 = vpop.f32.mrf.mxu1 }
 0x1e6   : > { %3858 = vst [vmem:[%s4998_s27 + $0x2c0] sm:$0xff] %v4344_v44  ;;  %3859 = vst [vmem:[%s4998_s27 + $0x2c8] sm:$0xff] %v4345_v45  ;;  %v2927_v50 = vadd.f32 %v4987_v4, %v1507_v46  ;;  %v2929_v51 = vadd.f32 %v4989_v5, %v1860_v47 }
 0x1e7   : > { %v1511_v52 = vpop.f32.mrf.mxu0  ;;  %v1864_v53 = vpop.f32.mrf.mxu1 }
 0x1e8   : > { %v4346_v54 = vpack.c.bf16 %v2927_v50, %v2926_v48  ;;  %v4347_v55 = vpack.c.bf16 %v2929_v51, %v2928_v49  ;;  %v2930_v58 = vadd.f32 %v4983_v2, %v1511_v52  ;;  %v2932_v59 = vadd.f32 %v4985_v3, %v1864_v53 }
 0x1e9   : > { %v1513_v56 = vpop.f32.mrf.mxu0  ;;  %v1866_v57 = vpop.f32.mrf.mxu1 }
 0x1ea   : > { %3860 = vst [vmem:[%s4998_s27 + $0x2d0] sm:$0xff] %v4346_v54  ;;  %3861 = vst [vmem:[%s4998_s27 + $0x2d8] sm:$0xff] %v4347_v55  ;;  %v2931_v60 = vadd.f32 %v4987_v4, %v1513_v56  ;;  %v2933_v61 = vadd.f32 %v4989_v5, %v1866_v57 }
 0x1eb   : > { %v1515_v62 = vpop.f32.mrf.mxu0  ;;  %v1868_v63 = vpop.f32.mrf.mxu1 }
 0x1ec   : > { %v4348_v1 = vpack.c.bf16 %v2931_v60, %v2930_v58  ;;  %v4349_v6 = vpack.c.bf16 %v2933_v61, %v2932_v59  ;;  %v2934_v9 = vadd.f32 %v4983_v2, %v1515_v62  ;;  %v2936_v10 = vadd.f32 %v4985_v3, %v1868_v63 }
 0x1ed   : > { %v1517_v7 = vpop.f32.mrf.mxu0  ;;  %v1870_v8 = vpop.f32.mrf.mxu1 }
 0x1ee   : > { %3862 = vst [vmem:[%s4998_s27 + $0x2e0] sm:$0xff] %v4348_v1  ;;  %3863 = vst [vmem:[%s4998_s27 + $0x2e8] sm:$0xff] %v4349_v6  ;;  %v2935_v11 = vadd.f32 %v4987_v4, %v1517_v7  ;;  %v2937_v12 = vadd.f32 %v4989_v5, %v1870_v8 }
 0x1ef   : > { %v1521_v13 = vpop.f32.mrf.mxu0  ;;  %v1874_v14 = vpop.f32.mrf.mxu1 }
 0x1f0   : > { %v4350_v15 = vpack.c.bf16 %v2935_v11, %v2934_v9  ;;  %v4351_v16 = vpack.c.bf16 %v2937_v12, %v2936_v10  ;;  %v2938_v19 = vadd.f32 %v4983_v2, %v1521_v13  ;;  %v2940_v20 = vadd.f32 %v4985_v3, %v1874_v14 }
 0x1f1   : > { %v1523_v17 = vpop.f32.mrf.mxu0  ;;  %v1876_v18 = vpop.f32.mrf.mxu1 }
 0x1f2   : > { %3864 = vst [vmem:[%s4998_s27 + $0x2f0] sm:$0xff] %v4350_v15  ;;  %3865 = vst [vmem:[%s4998_s27 + $0x2f8] sm:$0xff] %v4351_v16  ;;  %v2939_v21 = vadd.f32 %v4987_v4, %v1523_v17  ;;  %v2941_v22 = vadd.f32 %v4989_v5, %v1876_v18 }
 0x1f3   : > { %v1525_v23 = vpop.f32.mrf.mxu0  ;;  %v1878_v24 = vpop.f32.mrf.mxu1 }
 0x1f4   : > { %v4352_v25 = vpack.c.bf16 %v2939_v21, %v2938_v19  ;;  %v4353_v26 = vpack.c.bf16 %v2941_v22, %v2940_v20  ;;  %v2942_v0 = vadd.f32 %v4983_v2, %v1525_v23  ;;  %v2944_v29 = vadd.f32 %v4985_v3, %v1878_v24 }
 0x1f5   : > { %v1527_v27 = vpop.f32.mrf.mxu0  ;;  %v1880_v28 = vpop.f32.mrf.mxu1 }
 0x1f6   : > { %3866 = vst [vmem:[%s4998_s27 + $0x300] sm:$0xff] %v4352_v25  ;;  %3867 = vst [vmem:[%s4998_s27 + $0x308] sm:$0xff] %v4353_v26  ;;  %v2943_v30 = vadd.f32 %v4987_v4, %v1527_v27  ;;  %v2945_v31 = vadd.f32 %v4989_v5, %v1880_v28 }
 0x1f7   : > { %v1531_v32 = vpop.f32.mrf.mxu0  ;;  %v1884_v33 = vpop.f32.mrf.mxu1 }
 0x1f8   : > { %v4354_v34 = vpack.c.bf16 %v2943_v30, %v2942_v0  ;;  %v4355_v35 = vpack.c.bf16 %v2945_v31, %v2944_v29  ;;  %v2946_v38 = vadd.f32 %v4983_v2, %v1531_v32  ;;  %v2948_v39 = vadd.f32 %v4985_v3, %v1884_v33 }
 0x1f9   : > { %v1533_v36 = vpop.f32.mrf.mxu0  ;;  %v1886_v37 = vpop.f32.mrf.mxu1 }
 0x1fa   : > { %3868 = vst [vmem:[%s4998_s27 + $0x310] sm:$0xff] %v4354_v34  ;;  %3869 = vst [vmem:[%s4998_s27 + $0x318] sm:$0xff] %v4355_v35  ;;  %v2947_v40 = vadd.f32 %v4987_v4, %v1533_v36  ;;  %v2949_v41 = vadd.f32 %v4989_v5, %v1886_v37 }
 0x1fb   : > { %v1535_v42 = vpop.f32.mrf.mxu0  ;;  %v1888_v43 = vpop.f32.mrf.mxu1 }
 0x1fc   : > { %v4356_v44 = vpack.c.bf16 %v2947_v40, %v2946_v38  ;;  %v4357_v45 = vpack.c.bf16 %v2949_v41, %v2948_v39  ;;  %v2950_v48 = vadd.f32 %v4983_v2, %v1535_v42  ;;  %v2952_v49 = vadd.f32 %v4985_v3, %v1888_v43 }
 0x1fd   : > { %v1537_v46 = vpop.f32.mrf.mxu0  ;;  %v1890_v47 = vpop.f32.mrf.mxu1 }
 0x1fe   : > { %3870 = vst [vmem:[%s4998_s27 + $0x320] sm:$0xff] %v4356_v44  ;;  %3871 = vst [vmem:[%s4998_s27 + $0x328] sm:$0xff] %v4357_v45  ;;  %v2951_v50 = vadd.f32 %v4987_v4, %v1537_v46  ;;  %v2953_v51 = vadd.f32 %v4989_v5, %v1890_v47 }
 0x1ff   : > { %v1541_v52 = vpop.f32.mrf.mxu0  ;;  %v1894_v53 = vpop.f32.mrf.mxu1 }
 0x200   : > { %v4358_v54 = vpack.c.bf16 %v2951_v50, %v2950_v48  ;;  %v4359_v55 = vpack.c.bf16 %v2953_v51, %v2952_v49  ;;  %v2954_v58 = vadd.f32 %v4983_v2, %v1541_v52  ;;  %v2956_v59 = vadd.f32 %v4985_v3, %v1894_v53 }
 0x201   : > { %v1543_v56 = vpop.f32.mrf.mxu0  ;;  %v1896_v57 = vpop.f32.mrf.mxu1 }
 0x202   : > { %3872 = vst [vmem:[%s4998_s27 + $0x330] sm:$0xff] %v4358_v54  ;;  %3873 = vst [vmem:[%s4998_s27 + $0x338] sm:$0xff] %v4359_v55  ;;  %v2955_v60 = vadd.f32 %v4987_v4, %v1543_v56  ;;  %v2957_v61 = vadd.f32 %v4989_v5, %v1896_v57 }
 0x203   : > { %v1545_v62 = vpop.f32.mrf.mxu0  ;;  %v1898_v63 = vpop.f32.mrf.mxu1 }
 0x204   : > { %v4360_v1 = vpack.c.bf16 %v2955_v60, %v2954_v58  ;;  %v4361_v6 = vpack.c.bf16 %v2957_v61, %v2956_v59  ;;  %v2958_v9 = vadd.f32 %v4983_v2, %v1545_v62  ;;  %v2960_v10 = vadd.f32 %v4985_v3, %v1898_v63 }
 0x205   : > { %v1547_v7 = vpop.f32.mrf.mxu0  ;;  %v1900_v8 = vpop.f32.mrf.mxu1 }
 0x206   : > { %3874 = vst [vmem:[%s4998_s27 + $0x340] sm:$0xff] %v4360_v1  ;;  %3875 = vst [vmem:[%s4998_s27 + $0x348] sm:$0xff] %v4361_v6  ;;  %v2959_v11 = vadd.f32 %v4987_v4, %v1547_v7  ;;  %v2961_v12 = vadd.f32 %v4989_v5, %v1900_v8 }
 0x207   : > { %v1551_v13 = vpop.f32.mrf.mxu0  ;;  %v1904_v14 = vpop.f32.mrf.mxu1 }
 0x208   : > { %v4362_v15 = vpack.c.bf16 %v2959_v11, %v2958_v9  ;;  %v4363_v16 = vpack.c.bf16 %v2961_v12, %v2960_v10  ;;  %v2962_v19 = vadd.f32 %v4983_v2, %v1551_v13  ;;  %v2964_v20 = vadd.f32 %v4985_v3, %v1904_v14 }
 0x209   : > { %v1553_v17 = vpop.f32.mrf.mxu0  ;;  %v1906_v18 = vpop.f32.mrf.mxu1 }
 0x20a   : > { %3876 = vst [vmem:[%s4998_s27 + $0x350] sm:$0xff] %v4362_v15  ;;  %3877 = vst [vmem:[%s4998_s27 + $0x358] sm:$0xff] %v4363_v16  ;;  %v2963_v21 = vadd.f32 %v4987_v4, %v1553_v17  ;;  %v2965_v22 = vadd.f32 %v4989_v5, %v1906_v18 }
 0x20b   : > { %v1555_v23 = vpop.f32.mrf.mxu0  ;;  %v1908_v24 = vpop.f32.mrf.mxu1 }
 0x20c   : > { %v4364_v25 = vpack.c.bf16 %v2963_v21, %v2962_v19  ;;  %v4365_v26 = vpack.c.bf16 %v2965_v22, %v2964_v20  ;;  %v2966_v0 = vadd.f32 %v4983_v2, %v1555_v23  ;;  %v2968_v29 = vadd.f32 %v4985_v3, %v1908_v24 }
 0x20d   : > { %v1557_v27 = vpop.f32.mrf.mxu0  ;;  %v1910_v28 = vpop.f32.mrf.mxu1 }
 0x20e   : > { %3878 = vst [vmem:[%s4998_s27 + $0x360] sm:$0xff] %v4364_v25  ;;  %3879 = vst [vmem:[%s4998_s27 + $0x368] sm:$0xff] %v4365_v26  ;;  %v2967_v30 = vadd.f32 %v4987_v4, %v1557_v27  ;;  %v2969_v31 = vadd.f32 %v4989_v5, %v1910_v28 }
 0x20f   : > { %v1561_v32 = vpop.f32.mrf.mxu0  ;;  %v1914_v33 = vpop.f32.mrf.mxu1 }
 0x210   : > { %v4366_v34 = vpack.c.bf16 %v2967_v30, %v2966_v0  ;;  %v4367_v35 = vpack.c.bf16 %v2969_v31, %v2968_v29  ;;  %v2970_v38 = vadd.f32 %v4983_v2, %v1561_v32  ;;  %v2972_v39 = vadd.f32 %v4985_v3, %v1914_v33 }
 0x211   : > { %v1563_v36 = vpop.f32.mrf.mxu0  ;;  %v1916_v37 = vpop.f32.mrf.mxu1 }
 0x212   : > { %3880 = vst [vmem:[%s4998_s27 + $0x370] sm:$0xff] %v4366_v34  ;;  %3881 = vst [vmem:[%s4998_s27 + $0x378] sm:$0xff] %v4367_v35  ;;  %v2971_v40 = vadd.f32 %v4987_v4, %v1563_v36  ;;  %v2973_v41 = vadd.f32 %v4989_v5, %v1916_v37 }
 0x213   : > { %v1565_v42 = vpop.f32.mrf.mxu0  ;;  %v1918_v43 = vpop.f32.mrf.mxu1 }
 0x214   : > { %v4368_v44 = vpack.c.bf16 %v2971_v40, %v2970_v38  ;;  %v4369_v45 = vpack.c.bf16 %v2973_v41, %v2972_v39  ;;  %v2974_v48 = vadd.f32 %v4983_v2, %v1565_v42  ;;  %v2976_v49 = vadd.f32 %v4985_v3, %v1918_v43 }
 0x215   : > { %v1567_v46 = vpop.f32.mrf.mxu0  ;;  %v1920_v47 = vpop.f32.mrf.mxu1 }
 0x216   : > { %3882 = vst [vmem:[%s4998_s27 + $0x380] sm:$0xff] %v4368_v44  ;;  %3883 = vst [vmem:[%s4998_s27 + $0x388] sm:$0xff] %v4369_v45  ;;  %v2975_v50 = vadd.f32 %v4987_v4, %v1567_v46  ;;  %v2977_v51 = vadd.f32 %v4989_v5, %v1920_v47 }
 0x217   : > { %v1571_v52 = vpop.f32.mrf.mxu0  ;;  %v1924_v53 = vpop.f32.mrf.mxu1 }
 0x218   : > { %v4370_v54 = vpack.c.bf16 %v2975_v50, %v2974_v48  ;;  %v4371_v55 = vpack.c.bf16 %v2977_v51, %v2976_v49  ;;  %v2978_v58 = vadd.f32 %v4983_v2, %v1571_v52  ;;  %v2980_v59 = vadd.f32 %v4985_v3, %v1924_v53 }
 0x219   : > { %v1573_v56 = vpop.f32.mrf.mxu0  ;;  %v1926_v57 = vpop.f32.mrf.mxu1 }
 0x21a   : > { %3884 = vst [vmem:[%s4998_s27 + $0x390] sm:$0xff] %v4370_v54  ;;  %3885 = vst [vmem:[%s4998_s27 + $0x398] sm:$0xff] %v4371_v55  ;;  %v2979_v60 = vadd.f32 %v4987_v4, %v1573_v56  ;;  %v2981_v61 = vadd.f32 %v4989_v5, %v1926_v57 }
 0x21b   : > { %v1575_v62 = vpop.f32.mrf.mxu0  ;;  %v1928_v63 = vpop.f32.mrf.mxu1 }
 0x21c   : > { %v4372_v1 = vpack.c.bf16 %v2979_v60, %v2978_v58  ;;  %v4373_v6 = vpack.c.bf16 %v2981_v61, %v2980_v59  ;;  %v2982_v9 = vadd.f32 %v4983_v2, %v1575_v62  ;;  %v2984_v10 = vadd.f32 %v4985_v3, %v1928_v63 }
 0x21d   : > { %v1577_v7 = vpop.f32.mrf.mxu0  ;;  %v1930_v8 = vpop.f32.mrf.mxu1 }
 0x21e   : > { %3886 = vst [vmem:[%s4998_s27 + $0x3a0] sm:$0xff] %v4372_v1  ;;  %3887 = vst [vmem:[%s4998_s27 + $0x3a8] sm:$0xff] %v4373_v6  ;;  %v2983_v11 = vadd.f32 %v4987_v4, %v1577_v7  ;;  %v2985_v12 = vadd.f32 %v4989_v5, %v1930_v8 }
 0x21f   : > { %v1581_v13 = vpop.f32.mrf.mxu0  ;;  %v1934_v14 = vpop.f32.mrf.mxu1 }
 0x220   : > { %v4374_v15 = vpack.c.bf16 %v2983_v11, %v2982_v9  ;;  %v4375_v16 = vpack.c.bf16 %v2985_v12, %v2984_v10  ;;  %v2986_v19 = vadd.f32 %v4983_v2, %v1581_v13  ;;  %v2988_v20 = vadd.f32 %v4985_v3, %v1934_v14 }
 0x221   : > { %v1583_v17 = vpop.f32.mrf.mxu0  ;;  %v1936_v18 = vpop.f32.mrf.mxu1 }
 0x222   : > { %3888 = vst [vmem:[%s4998_s27 + $0x3b0] sm:$0xff] %v4374_v15  ;;  %3889 = vst [vmem:[%s4998_s27 + $0x3b8] sm:$0xff] %v4375_v16  ;;  %v2987_v21 = vadd.f32 %v4987_v4, %v1583_v17  ;;  %v2989_v22 = vadd.f32 %v4989_v5, %v1936_v18 }
 0x223   : > { %v1585_v23 = vpop.f32.mrf.mxu0  ;;  %v1938_v24 = vpop.f32.mrf.mxu1 }
 0x224   : > { %v4376_v25 = vpack.c.bf16 %v2987_v21, %v2986_v19  ;;  %v4377_v26 = vpack.c.bf16 %v2989_v22, %v2988_v20  ;;  %v2990_v0 = vadd.f32 %v4983_v2, %v1585_v23  ;;  %v2992_v29 = vadd.f32 %v4985_v3, %v1938_v24 }
 0x225   : > { %v1587_v27 = vpop.f32.mrf.mxu0  ;;  %v1940_v28 = vpop.f32.mrf.mxu1 }
 0x226   : > { %3890 = vst [vmem:[%s4998_s27 + $0x3c0] sm:$0xff] %v4376_v25  ;;  %3891 = vst [vmem:[%s4998_s27 + $0x3c8] sm:$0xff] %v4377_v26  ;;  %v2991_v30 = vadd.f32 %v4987_v4, %v1587_v27  ;;  %v2993_v31 = vadd.f32 %v4989_v5, %v1940_v28 }
 0x227   : > { %v1591_v32 = vpop.f32.mrf.mxu0  ;;  %v1944_v33 = vpop.f32.mrf.mxu1 }
 0x228   : > { %v4378_v34 = vpack.c.bf16 %v2991_v30, %v2990_v0  ;;  %v4379_v35 = vpack.c.bf16 %v2993_v31, %v2992_v29  ;;  %v2994_v38 = vadd.f32 %v4983_v2, %v1591_v32  ;;  %v2996_v39 = vadd.f32 %v4985_v3, %v1944_v33 }
 0x229   : > { %v1593_v36 = vpop.f32.mrf.mxu0  ;;  %v1946_v37 = vpop.f32.mrf.mxu1 }
 0x22a   : > { %3892 = vst [vmem:[%s4998_s27 + $0x3d0] sm:$0xff] %v4378_v34  ;;  %3893 = vst [vmem:[%s4998_s27 + $0x3d8] sm:$0xff] %v4379_v35  ;;  %v2995_v40 = vadd.f32 %v4987_v4, %v1593_v36  ;;  %v2997_v41 = vadd.f32 %v4989_v5, %v1946_v37 }
 0x22b   : > { %v1595_v42 = vpop.f32.mrf.mxu0  ;;  %v1948_v43 = vpop.f32.mrf.mxu1 }
 0x22c   : > { %v4380_v44 = vpack.c.bf16 %v2995_v40, %v2994_v38  ;;  %v4381_v45 = vpack.c.bf16 %v2997_v41, %v2996_v39  ;;  %v2998_v48 = vadd.f32 %v4983_v2, %v1595_v42  ;;  %v3000_v49 = vadd.f32 %v4985_v3, %v1948_v43 }
 0x22d   : > { %v1597_v46 = vpop.f32.mrf.mxu0  ;;  %v1950_v47 = vpop.f32.mrf.mxu1 }
 0x22e   : > { %3894 = vst [vmem:[%s4998_s27 + $0x3e0] sm:$0xff] %v4380_v44  ;;  %3895 = vst [vmem:[%s4998_s27 + $0x3e8] sm:$0xff] %v4381_v45  ;;  %v2999_v50 = vadd.f32 %v4987_v4, %v1597_v46  ;;  %v3001_v51 = vadd.f32 %v4989_v5, %v1950_v47 }
 0x230   : > { %v4382_v52 = vpack.c.bf16 %v2999_v50, %v2998_v48  ;;  %v4383_v53 = vpack.c.bf16 %v3001_v51, %v3000_v49 }
 0x232   : > { %3896 = vst [vmem:[%s4998_s27 + $0x3f0] sm:$0xff] %v4382_v52  ;;  %3897 = vst [vmem:[%s4998_s27 + $0x3f8] sm:$0xff] %v4383_v53 }
 0x233   : > { %4647 = shalt.err (!%p4644_p6)
}
 0x234   : > { %s4648_s29 = scalar_lea.hbm %s5395_s4, 16384  ;;  %s4652_s5 = scalar_lea.hbm %s5450_s3, 32768 }
 0x235   : > { %p4649_p8 = scmp.ne.s32.totalorder %s5395_s4, %s4648_s29  ;;  %p4653_p11 = scmp.lt.s32.totalorder %s5395_s4, %s5450_s3 }
 0x236   : > { %p4654_p12 = scmp.lt.s32.totalorder %s4652_s5, %s4648_s29 }
 0x237   : > { %p4650_p5 = pnand %p4649_p8, %p5463_p10 }
 0x238   : > { %p4655_p13 = por %p4654_p12, %p4653_p11 }
 0x239   : > { %p4651_p9 = pneg %p4650_p5 }
 0x23b   : > { %p4656_p7 = pnand %p4655_p13, %p4651_p9 }
 0x23d   : > { %4659 = shalt.err (!%p4656_p7)
}
 0x23e   : > { %s4730_s27 = smov 256   ;;  %s4731_s10 = smov 512  }
 0x23f   : > { %s4732_s15 = smov 16  }
 0x240   : > { %4393 = dma.vmem_to_hbm [thread:$0]  (%p5463_p10), %s5397_s19, 16384, %s5395_s4, %s3899_s8, %s4730_s27, %s4731_s10, %s4732_s15  }
 0x241 PF: > { %s3930_s6 = sand.u32 1, %s4698_s12   ;;  %p5464_p2 = scmp.ne.s32.totalorder %s5457_s26, 0 }
 0x242   : > { %p5465_p1 = scmp.ge.s32.totalorder %s4718_s17, 2  ;;  %s3931_s9 = scalar_lea.sflag [#allocation5], %s3930_s6 }
 0x244   : > { %p4407_p0 = pnand %p5465_p1, %p5464_p2 }
 0x246   : > { %p4408_p3 = pneg %p4407_p0 }
 0x248   : > { %4693 = dma.done.wait (%p4408_p3), %s3931_s9, 16384  }
 0x249   : > { %4695 = vsyncadd (%p4408_p3), %s3931_s9, 4294950912  ;;  %s20_s17 = sadd.s32 1, %s4718_s17   ;;  %s5466_s12 = smov %s4702_s13 }
 0x24a   : > { %p17_p4 = scmp.ge.s32.totalorder %s20_s17, 4   ;;  %s5467_s13 = smov %s4706_s14 }
 0x24b   : > { %s5468_s14 = smov %s4801_s24  ;;  %s5469_s15 = smov %s4714_s16 }
 0x24c   : > { %s5470_s16 = smov %s5472_s18  ;;  %19 = sbr.rel (!%p17_p4) target bundleno = 7 (0x7), region = 102 }
 0x251   :  { %3936 = vsyncpa [#allocation4], 1 }
 0x252   :  { %3938 = vsyncpa [#allocation4 + $0x1], 1 }
 0x253   :  { %3939 = vsyncpa [#allocation7], 1 }
 0x254   :  { %3941 = vsyncpa [#allocation7 + $0x1], 1 }
 0x255   :  { %3942 = vsyncpa [#allocation5], 1 }
 0x256   :  { %3944 = vsyncpa [#allocation5 + $0x1], 1 }

</bundles_post_ra>
